<compile_context>
chip_gen: v5e
topology: v5e:2x2
jax: 0.10.0
libtpu: 0.0.40
codegen_flags: <defaults>
</compile_context>

<pallas_src>
import functools

import jax
import jax.numpy as jnp
import numpy as np
from jax.experimental import pallas as pl
from jax.experimental.pallas import tpu as pltpu

_LANE = 128
_SUBLANE = 8
_MIN_TILE = _LANE * _SUBLANE  # 1024 -> every (R,128) block is (8,128)-aligned


# --------------------------------------------------------------------------- #
# Pallas kernel: all six loss terms (focal, smooth-L1, MSE, GIoU) fused.
#   data_ref : (D, R, 128)  feature-major channels, R = lane_tile // 128
#              channel layout (C = num_classes, Dc = 1 + C):
#                0            objectness logit
#                1 .. C       class logits
#                Dc .. Dc+3   box logits (xywh)
#                Dc+4..Dc+7   target box (xywh)
#                Dc+8         target objectness (0/1)
#                Dc+9..       target one-hot classes
#   out_ref  : (1, 6, R, 128) per-lane unweighted partial sums; resident
#              across the reduction axis (accumulator).  Weights host-side.
# --------------------------------------------------------------------------- #
def _center_loss_kernel(data_ref, out_ref, *, alpha, gamma, num_classes,
                        n_valid, lane_tile):
    c = pl.program_id(0)          # "parallel" core-split axis
    i = pl.program_id(1)          # "arbitrary" reduction axis over B*N tiles
    n_i = pl.num_programs(1)

    Dc = 1 + num_classes
    R = lane_tile // _LANE

    @pl.when(i == 0)
    def _():
        out_ref[...] = jnp.zeros_like(out_ref)

    # ---- validity mask for lanes padded past B*N ---------------------------
    base = (c * n_i + i) * lane_tile
    ridx = jax.lax.broadcasted_iota(jnp.int32, (R, _LANE), 0)
    lidx = jax.lax.broadcasted_iota(jnp.int32, (R, _LANE), 1)
    valid = ((base + ridx * _LANE + lidx) < n_valid).astype(jnp.float32)

    t_obj = data_ref[Dc + 8].astype(jnp.float32)
    is_pos = (t_obj > 0.5).astype(jnp.float32)
    pos = is_pos * valid
    neg = (1.0 - is_pos) * valid

    def sigmoid(z):
        # one EUP op (tanh) instead of exp + reciprocal
        return 0.5 * (jnp.tanh(0.5 * z) + 1.0)

    def modulator(u):
        if gamma == 2.0:                      # compile-time constant
            return u * u
        return jnp.power(jnp.maximum(u, 0.0), gamma)

    def bce_correction(p):
        # log1p(exp(-|x|)) == -log(max(p, 1-p)); max(p,1-p) in [0.5, 1] so the
        # log is always well-defined -> numerically safe, reuses sigmoid.
        return -jnp.log(jnp.maximum(p, 1.0 - p))

    # ---- objectness focal (t=1 on positives, t=0 on negatives) -------------
    xo = data_ref[0].astype(jnp.float32)
    p = sigmoid(xo)
    corr = bce_correction(p)
    relu_x = jnp.maximum(xo, 0.0)
    ce1 = relu_x - xo + corr                   # BCE(x, t=1)
    ce0 = relu_x + corr                        # BCE(x, t=0)
    row_conf = (alpha * ce1) * modulator(1.0 - p) * pos
    row_noconf = ((1.0 - alpha) * ce0) * modulator(p) * neg

    # ---- box: sigmoid shared between smooth-L1 and GIoU --------------------
    bx = sigmoid(data_ref[Dc + 0].astype(jnp.float32))
    by = sigmoid(data_ref[Dc + 1].astype(jnp.float32))
    bw = sigmoid(data_ref[Dc + 2].astype(jnp.float32))
    bh = sigmoid(data_ref[Dc + 3].astype(jnp.float32))
    tx = data_ref[Dc + 4].astype(jnp.float32)
    ty = data_ref[Dc + 5].astype(jnp.float32)
    tw = data_ref[Dc + 6].astype(jnp.float32)
    th = data_ref[Dc + 7].astype(jnp.float32)

    beta = 2e-5

    def smooth_l1(a, b):
        d = jnp.abs(a - b)
        return jnp.where(d < beta, (0.5 / beta) * d * d, d - 0.5 * beta)

    row_box = (smooth_l1(bx, tx) + smooth_l1(by, ty)
               + smooth_l1(bw, tw) + smooth_l1(bh, th)) * pos

    # ---- GIoU (exact divides: this term is weighted x10 downstream) --------
    x1, y1 = bx - bw * 0.5, by - bh * 0.5
    x2, y2 = bx + bw * 0.5, by + bh * 0.5
    x1g, y1g = tx - tw * 0.5, ty - th * 0.5
    x2g, y2g = tx + tw * 0.5, ty + th * 0.5
    xkis1 = jnp.maximum(x1, x1g)
    ykis1 = jnp.maximum(y1, y1g)
    xkis2 = jnp.minimum(x2, x2g)
    ykis2 = jnp.minimum(y2, y2g)
    inter = jnp.where((ykis2 > ykis1) & (xkis2 > xkis1),
                      (xkis2 - xkis1) * (ykis2 - ykis1), 0.0)
    union = (x2 - x1) * (y2 - y1) + (x2g - x1g) * (y2g - y1g) - inter
    area_c = ((jnp.maximum(x2, x2g) - jnp.minimum(x1, x1g))
              * (jnp.maximum(y2, y2g) - jnp.minimum(y1, y1g)))
    eps = 1e-7
    iou = inter / (union + eps)
    miou = iou - (area_c - union) / (area_c + eps)
    row_iou = (1.0 - miou) * pos

    # ---- per-class focal + negative-class MSE (dense (R,128) per channel) --
    row_clf = None
    row_noclf = None
    for k in range(num_classes):
        xc = data_ref[1 + k].astype(jnp.float32)
        tc = data_ref[Dc + 9 + k].astype(jnp.float32)
        pc = sigmoid(xc)
        ce_c = jnp.maximum(xc, 0.0) - xc * tc + bce_correction(pc)
        p_t = pc * tc + (1.0 - pc) * (1.0 - tc)
        a_t = alpha * tc + (1.0 - alpha) * (1.0 - tc)
        f = a_t * ce_c * modulator(1.0 - p_t)
        sq = pc * pc
        row_clf = f if row_clf is None else row_clf + f
        row_noclf = sq if row_noclf is None else row_noclf + sq
    row_clf = row_clf * pos
    row_noclf = row_noclf * neg

    # ---- six independent lane-dense accumulates into the resident output ---
    out_ref[0, 0] += row_conf
    out_ref[0, 1] += row_noconf
    out_ref[0, 2] += row_box
    out_ref[0, 3] += row_clf
    out_ref[0, 4] += row_noclf
    out_ref[0, 5] += row_iou


def center_loss_pallas(pred_cls, pred_box, targets, *, alpha=0.25, gamma=2.0,
                       lane_tile=8192, core_splits=1):
    """pred_cls: (B,N,1+C), pred_box: (B,N,4), targets: (B,N,5+C) -> dict of scalars."""
    B, N, Dc = pred_cls.shape
    Db = pred_box.shape[-1]
    Dt = targets.shape[-1]
    num_classes = Dc - 1
    assert Db == 4 and Dt == 5 + num_classes
    M = B * N
    D = Dc + Db + Dt

    # lane_tile must be a multiple of 8*128 so every (R,128) block is aligned;
    # clamp so tiny problems don't over-pad.  (On v7x keep lane_tile <= 32768
    # so double-buffered tiles stay well under the 64 MiB VMEM.)
    per_core = -(-M // core_splits)
    cap = -(-per_core // _MIN_TILE) * _MIN_TILE
    lane_tile = max(_MIN_TILE, min(int(lane_tile), cap))
    lane_tile = (lane_tile // _MIN_TILE) * _MIN_TILE
    R = lane_tile // _LANE

    chunk = lane_tile * core_splits
    m_pad = -(-M // chunk) * chunk
    tiles_per_core = m_pad // chunk
    rows_total = m_pad // _LANE

    # One feature-major, lane-dense slab (D, M_pad//128, 128): every channel
    # is its own (rows,128)-aligned plane and each grid step does ONE DMA.
    # TODO(synk): fold this concat/transpose into the producing detection head
    # so the loss consumes (D, M/128, 128) directly (saves an extra HBM pass).
    dtype = jnp.result_type(pred_cls.dtype, pred_box.dtype, targets.dtype)
    data = jnp.concatenate(
        [pred_cls.reshape(M, Dc), pred_box.reshape(M, Db),
         targets.reshape(M, Dt)], axis=-1).astype(dtype)            # (M, D)
    data = data.T                                                   # (D, M)
    if m_pad != M:
        data = jnp.pad(data, ((0, 0), (0, m_pad - M)))
    data = data.reshape(D, rows_total, _LANE)

    kernel = functools.partial(
        _center_loss_kernel, alpha=float(alpha), gamma=float(gamma),
        num_classes=num_classes, n_valid=M, lane_tile=lane_tile)

    # Advisory cost estimate (pure VPU/EUP elementwise loss, no matmuls).
    cost = pl.CostEstimate(
        flops=int(M) * (90 + 30 * num_classes),
        transcendentals=int(M) * (8 + 2 * num_classes),
        bytes_accessed=int(data.size * data.dtype.itemsize
                           + core_splits * 6 * R * _LANE * 4),
    )

    out = pl.pallas_call(
        kernel,
        out_shape=jax.ShapeDtypeStruct((core_splits, 6, R, _LANE), jnp.float32),
        grid_spec=pltpu.PrefetchScalarGridSpec(
            num_scalar_prefetch=0,
            grid=(core_splits, tiles_per_core),
            in_specs=[pl.BlockSpec(
                (D, R, _LANE),
                lambda c, i: (0, c * tiles_per_core + i, 0))],
            out_specs=pl.BlockSpec(
                (1, 6, R, _LANE), lambda c, i: (c, 0, 0, 0)),
        ),
        compiler_params=pltpu.CompilerParams(
            # On v7x, axis 0 with core_splits=2 can be set to
            # pltpu.CORE_PARALLEL to guarantee the 2-TensorCore split.
            dimension_semantics=("parallel", "arbitrary")),
        cost_estimate=cost,
    )(data)

    sums = jnp.sum(out, axis=(0, 2, 3))     # (6,) unweighted loss sums
    return {
        'loss_conf': sums[0],
        'loss_no_conf': sums[1] * 0.05,
        'loss_box': sums[2],
        'loss_clf': sums[3],
        'loss_no_clf': sums[4] * 0.05,
        'loss_iou': sums[5] * 10.0,
    }


# --------------------------------------------------------------------------- #
# Glue: CenterLoss.normalize (scatter of GT boxes onto the anchor grid).
# Data-dependent scatter over a handful of boxes; done on host in numpy.
# --------------------------------------------------------------------------- #
def normalize_targets(targets_list, strides, num_anchors, num_classes):
    outs = []
    for target in targets_list:
        h, w = target['resize']
        boxes = np.asarray(target['boxes'], dtype=np.float32)
        labels = np.asarray(target['labels'], dtype=np.int64)
        per_stride = []
        for stride in strides:
            gh, gw = h // stride, w // stride
            result = np.zeros((1, gh, gw, num_anchors, 5 + num_classes), np.float32)
            x1, y1, x2, y2 = boxes[:, 0], boxes[:, 1], boxes[:, 2], boxes[:, 3]
            x0 = (x1 + x2) / 2.0
            y0 = (y1 + y2) / 2.0
            wb = (x2 - x1) / w
            hb = (y2 - y1) / h
            gx = (x0 / stride).astype(np.int32)
            gy = (y0 / stride).astype(np.int32)
            x0n = x0 / w
            y0n = y0 / h
            for i in range(boxes.shape[0]):
                result[0, gy[i], gx[i], :, 0] = x0n[i]
                result[0, gy[i], gx[i], :, 1] = y0n[i]
                result[0, gy[i], gx[i], :, 2] = wb[i]
                result[0, gy[i], gx[i], :, 3] = hb[i]
                result[0, gy[i], gx[i], :, 4] = 1.0
                result[0, gy[i], gx[i], :, 5 + int(labels[i])] = 1.0
            per_stride.append(result.reshape(1, -1, 5 + num_classes))
        outs.append(np.concatenate(per_stride, axis=1))
    return np.concatenate(outs, axis=0)


# --------------------------------------------------------------------------- #
# Plain-JAX reference (same math, no Pallas) used for a correctness check.
# --------------------------------------------------------------------------- #
def center_loss_ref(pred_cls, pred_box, targets, alpha=0.25, gamma=2.0):
    pred_cls = pred_cls.astype(jnp.float32)
    pred_box = pred_box.astype(jnp.float32)
    tgt = targets.astype(jnp.float32)
    pos = (tgt[..., 4] > 0.5).astype(jnp.float32)
    neg = 1.0 - pos

    def bce(x, t):
        return jnp.maximum(x, 0.0) - x * t + jnp.log1p(jnp.exp(-jnp.abs(x)))

    def focal(x, t):
        p = jax.nn.sigmoid(x)
        p_t = p * t + (1 - p) * (1 - t)
        a_t = alpha * t + (1 - alpha) * (1 - t)
        return a_t * bce(x, t) * (1 - p_t) ** gamma

    conf = pred_cls[..., 0]
    cls_logits = pred_cls[..., 1:]
    tbox = tgt[..., :4]
    tcls = tgt[..., 5:]
    sbox = jax.nn.sigmoid(pred_box)
    beta = 2e-05
    d = jnp.abs(sbox - tbox)
    sl1 = jnp.where(d < beta, 0.5 * d * d / beta, d - 0.5 * beta)
    scls = jax.nn.sigmoid(cls_logits)

    def xyxy(b):
        return jnp.concatenate((b[..., :2] - b[..., 2:] / 2,
                                b[..., :2] + b[..., 2:] / 2), -1)

    pb, tb = xyxy(sbox), xyxy(tbox)
    xkis1 = jnp.maximum(pb[..., 0], tb[..., 0]); ykis1 = jnp.maximum(pb[..., 1], tb[..., 1])
    xkis2 = jnp.minimum(pb[..., 2], tb[..., 2]); ykis2 = jnp.minimum(pb[..., 3], tb[..., 3])
    inter = jnp.where((ykis2 > ykis1) & (xkis2 > xkis1),
                      (xkis2 - xkis1) * (ykis2 - ykis1), 0.0)
    union = ((pb[..., 2] - pb[..., 0]) * (pb[..., 3] - pb[..., 1])
             + (tb[..., 2] - tb[..., 0]) * (tb[..., 3] - tb[..., 1]) - inter)
    eps = 1e-7
    iou = inter / (union + eps)
    area_c = ((jnp.maximum(pb[..., 2], tb[..., 2]) - jnp.minimum(pb[..., 0], tb[..., 0]))
              * (jnp.maximum(pb[..., 3], tb[..., 3]) - jnp.minimum(pb[..., 1], tb[..., 1])))
    giou = 1.0 - (iou - (area_c - union) / (area_c + eps))

    return {
        'loss_conf': jnp.sum(focal(conf, 1.0) * pos),
        'loss_no_conf': jnp.sum(focal(conf, 0.0) * neg) * 0.05,
        'loss_box': jnp.sum(sl1 * pos[..., None]),
        'loss_clf': jnp.sum(focal(cls_logits, tcls) * pos[..., None]),
        'loss_no_clf': jnp.sum(scls * scls * neg[..., None]) * 0.05,
        'loss_iou': jnp.sum(giou * pos) * 10.0,
    }


# TODO(synk): the inference branch (predict / reverse_normalize / apply_nms) is
# data-dependent filtering + NMS with dynamic shapes and has no clean Pallas
# equivalent; only the training loss path (compute_loss) is implemented here.

if __name__ == "__main__":
    # cfg-equivalent hyperparameters (deterministic, in-script)
    num_anchors = 3
    num_classes = 8
    strides = [8, 16]
    resize = (128, 128)
    alpha, gamma = 0.25, 2.0

    B = 2
    N = sum((resize[0] // s) * (resize[1] // s) * num_anchors for s in strides)  # 960

    key = jax.random.PRNGKey(0)
    k1, k2 = jax.random.split(key)
    pred_cls = jax.random.normal(k1, (B, N, 1 + num_classes), dtype=jnp.float32)
    pred_box = jax.random.normal(k2, (B, N, 4), dtype=jnp.float32)

    targets_origin = [
        {'boxes': [[8.0, 8.0, 40.0, 40.0], [20.0, 24.0, 80.0, 100.0],
                   [66.0, 60.0, 120.0, 120.0]],
         'labels': [0, 2, 5], 'resize': resize},
        {'boxes': [[4.0, 12.0, 60.0, 80.0], [40.0, 44.0, 100.0, 126.0]],
         'labels': [1, 7], 'resize': resize},
    ]
    targets = jnp.asarray(
        normalize_targets(targets_origin, strides, num_anchors, num_classes))

    ref = center_loss_ref(pred_cls, pred_box, targets, alpha=alpha, gamma=gamma)

    # Config 1: single core-split, lane_tile=1024 -> M=1920 pads to 2 reduction
    # tiles, exercising the i>0 accumulation path.
    losses = center_loss_pallas(pred_cls, pred_box, targets, alpha=alpha,
                                gamma=gamma, lane_tile=1024, core_splits=1)
    losses = jax.tree_util.tree_map(jax.block_until_ready, losses)
    for k in losses:
        np.testing.assert_allclose(np.asarray(losses[k]), np.asarray(ref[k]),
                                   rtol=2e-3, atol=2e-3)

    # Config 2: two core-splits (parallel grid axis), one tile per core.
    losses2 = center_loss_pallas(pred_cls, pred_box, targets, alpha=alpha,
                                 gamma=gamma, lane_tile=1024, core_splits=2)
    losses2 = jax.tree_util.tree_map(jax.block_until_ready, losses2)
    for k in losses2:
        np.testing.assert_allclose(np.asarray(losses2[k]), np.asarray(ref[k]),
                                   rtol=2e-3, atol=2e-3)

    print("KERNEL_OK")
</pallas_src>

<mosaic_0001>
module attributes {stable_mosaic.version = 11 : i64} {
  func.func @_center_loss_kernel(%arg0: i32, %arg1: i32, %arg2: memref<26x8x128xf32, #tpu.memory_space<vmem>>, %arg3: memref<1x6x8x128xf32, #tpu.memory_space<vmem>>) attributes {dimension_semantics = [#tpu.dimension_semantics<parallel>, #tpu.dimension_semantics<arbitrary>], iteration_bounds = array<i64: 1, 2>, scalar_prefetch = 0 : i64, scratch_operands = 0 : i64, tpu.core_type = #tpu.core_type<tc>, window_params = [{transform_indices = @transform_0, window_bounds = array<i64: 26, 8, 128>}, {transform_indices = @transform_1, window_bounds = array<i64: 1, 6, 8, 128>}]} {
    %c0_i32 = arith.constant 0 : i32
    %0 = arith.cmpi eq, %arg1, %c0_i32 : i32
    %1 = arith.extui %0 : i1 to i32
    %c0_i32_0 = arith.constant 0 : i32
    %2 = arith.cmpi ne, %1, %c0_i32_0 : i32
    scf.if %2 {
      %cst_243 = arith.constant 0.000000e+00 : f32
      %597 = vector.broadcast %cst_243 : f32 to vector<1x6x8x128xf32>
      %c0_244 = arith.constant 0 : index
      %c0_245 = arith.constant 0 : index
      %c0_246 = arith.constant 0 : index
      %c0_247 = arith.constant 0 : index
      %598 = vector.load %arg3[%c0_244, %c0_245, %c0_246, %c0_247] : memref<1x6x8x128xf32, #tpu.memory_space<vmem>>, vector<1x6x8x128xf32>
      tpu.vector_store %arg3[%c0_244, %c0_245, %c0_246, %c0_247], %597 {strides = array<i32>} : memref<1x6x8x128xf32, #tpu.memory_space<vmem>>, vector<1x6x8x128xf32>,
    } else {
    }
    %c2_i32 = arith.constant 2 : i32
    %3 = arith.muli %arg0, %c2_i32 : i32
    %4 = arith.addi %3, %arg1 : i32
    %c1024_i32 = arith.constant 1024 : i32
    %5 = arith.muli %4, %c1024_i32 : i32
    %6 = tpu.iota {dimensions = array<i32: 0>} : vector<8x128xi32>
    %7 = tpu.iota {dimensions = array<i32: 1>} : vector<8x128xi32>
    %c128_i32 = arith.constant 128 : i32
    %8 = vector.broadcast %c128_i32 : i32 to vector<8x128xi32>
    %9 = arith.muli %6, %8 : vector<8x128xi32>
    %10 = vector.broadcast %5 : i32 to vector<8x128xi32>
    %11 = arith.addi %10, %9 : vector<8x128xi32>
    %12 = arith.addi %11, %7 : vector<8x128xi32>
    %c1920_i32 = arith.constant 1920 : i32
    %13 = vector.broadcast %c1920_i32 : i32 to vector<8x128xi32>
    %14 = arith.cmpi slt, %12, %13 : vector<8x128xi32>
    %15 = arith.extui %14 : vector<8x128xi1> to vector<8x128xi32>
    %16 = arith.sitofp %15 : vector<8x128xi32> to vector<8x128xf32>
    %c17 = arith.constant 17 : index
    %c0 = arith.constant 0 : index
    %c0_1 = arith.constant 0 : index
    %17 = vector.load %arg2[%c17, %c0, %c0_1] : memref<26x8x128xf32, #tpu.memory_space<vmem>>, vector<1x8x128xf32>
    %18 = vector.shape_cast %17 : vector<1x8x128xf32> to vector<8x128xf32>
    %cst = arith.constant 5.000000e-01 : f32
    %19 = vector.broadcast %cst : f32 to vector<8x128xf32>
    %20 = arith.cmpf ogt, %18, %19 : vector<8x128xf32>
    %21 = arith.extui %20 : vector<8x128xi1> to vector<8x128xi32>
    %22 = arith.sitofp %21 : vector<8x128xi32> to vector<8x128xf32>
    %23 = arith.mulf %22, %16 : vector<8x128xf32>
    %cst_2 = arith.constant 1.000000e+00 : f32
    %24 = vector.broadcast %cst_2 : f32 to vector<8x128xf32>
    %25 = arith.subf %24, %22 : vector<8x128xf32>
    %26 = arith.mulf %25, %16 : vector<8x128xf32>
    %c0_3 = arith.constant 0 : index
    %c0_4 = arith.constant 0 : index
    %c0_5 = arith.constant 0 : index
    %27 = vector.load %arg2[%c0_3, %c0_4, %c0_5] : memref<26x8x128xf32, #tpu.memory_space<vmem>>, vector<1x8x128xf32>
    %28 = vector.shape_cast %27 : vector<1x8x128xf32> to vector<8x128xf32>
    %cst_6 = arith.constant 5.000000e-01 : f32
    %29 = vector.broadcast %cst_6 : f32 to vector<8x128xf32>
    %30 = arith.mulf %29, %28 : vector<8x128xf32>
    %31 = math.tanh %30 : vector<8x128xf32>
    %cst_7 = arith.constant 1.000000e+00 : f32
    %32 = vector.broadcast %cst_7 : f32 to vector<8x128xf32>
    %33 = arith.addf %31, %32 : vector<8x128xf32>
    %cst_8 = arith.constant 5.000000e-01 : f32
    %34 = vector.broadcast %cst_8 : f32 to vector<8x128xf32>
    %35 = arith.mulf %34, %33 : vector<8x128xf32>
    %cst_9 = arith.constant 1.000000e+00 : f32
    %36 = vector.broadcast %cst_9 : f32 to vector<8x128xf32>
    %37 = arith.subf %36, %35 : vector<8x128xf32>
    %38 = arith.maximumf %35, %37 : vector<8x128xf32>
    %39 = math.log %38 : vector<8x128xf32>
    %cst_10 = arith.constant 0.000000e+00 : f32
    %40 = vector.broadcast %cst_10 : f32 to vector<8x128xf32>
    %41 = arith.subf %40, %39 : vector<8x128xf32>
    %cst_11 = arith.constant 0.000000e+00 : f32
    %42 = vector.broadcast %cst_11 : f32 to vector<8x128xf32>
    %43 = arith.maximumf %28, %42 : vector<8x128xf32>
    %44 = arith.subf %43, %28 : vector<8x128xf32>
    %45 = arith.addf %44, %41 : vector<8x128xf32>
    %46 = arith.addf %43, %41 : vector<8x128xf32>
    %cst_12 = arith.constant 2.500000e-01 : f32
    %47 = vector.broadcast %cst_12 : f32 to vector<8x128xf32>
    %48 = arith.mulf %47, %45 : vector<8x128xf32>
    %cst_13 = arith.constant 1.000000e+00 : f32
    %49 = vector.broadcast %cst_13 : f32 to vector<8x128xf32>
    %50 = arith.subf %49, %35 : vector<8x128xf32>
    %51 = arith.mulf %50, %50 : vector<8x128xf32>
    %52 = arith.mulf %48, %51 : vector<8x128xf32>
    %53 = arith.mulf %52, %23 : vector<8x128xf32>
    %cst_14 = arith.constant 7.500000e-01 : f32
    %54 = vector.broadcast %cst_14 : f32 to vector<8x128xf32>
    %55 = arith.mulf %54, %46 : vector<8x128xf32>
    %56 = arith.mulf %35, %35 : vector<8x128xf32>
    %57 = arith.mulf %55, %56 : vector<8x128xf32>
    %58 = arith.mulf %57, %26 : vector<8x128xf32>
    %c9 = arith.constant 9 : index
    %c0_15 = arith.constant 0 : index
    %c0_16 = arith.constant 0 : index
    %59 = vector.load %arg2[%c9, %c0_15, %c0_16] : memref<26x8x128xf32, #tpu.memory_space<vmem>>, vector<1x8x128xf32>
    %60 = vector.shape_cast %59 : vector<1x8x128xf32> to vector<8x128xf32>
    %cst_17 = arith.constant 5.000000e-01 : f32
    %61 = vector.broadcast %cst_17 : f32 to vector<8x128xf32>
    %62 = arith.mulf %61, %60 : vector<8x128xf32>
    %63 = math.tanh %62 : vector<8x128xf32>
    %cst_18 = arith.constant 1.000000e+00 : f32
    %64 = vector.broadcast %cst_18 : f32 to vector<8x128xf32>
    %65 = arith.addf %63, %64 : vector<8x128xf32>
    %cst_19 = arith.constant 5.000000e-01 : f32
    %66 = vector.broadcast %cst_19 : f32 to vector<8x128xf32>
    %67 = arith.mulf %66, %65 : vector<8x128xf32>
    %c10 = arith.constant 10 : index
    %c0_20 = arith.constant 0 : index
    %c0_21 = arith.constant 0 : index
    %68 = vector.load %arg2[%c10, %c0_20, %c0_21] : memref<26x8x128xf32, #tpu.memory_space<vmem>>, vector<1x8x128xf32>
    %69 = vector.shape_cast %68 : vector<1x8x128xf32> to vector<8x128xf32>
    %cst_22 = arith.constant 5.000000e-01 : f32
    %70 = vector.broadcast %cst_22 : f32 to vector<8x128xf32>
    %71 = arith.mulf %70, %69 : vector<8x128xf32>
    %72 = math.tanh %71 : vector<8x128xf32>
    %cst_23 = arith.constant 1.000000e+00 : f32
    %73 = vector.broadcast %cst_23 : f32 to vector<8x128xf32>
    %74 = arith.addf %72, %73 : vector<8x128xf32>
    %cst_24 = arith.constant 5.000000e-01 : f32
    %75 = vector.broadcast %cst_24 : f32 to vector<8x128xf32>
    %76 = arith.mulf %75, %74 : vector<8x128xf32>
    %c11 = arith.constant 11 : index
    %c0_25 = arith.constant 0 : index
    %c0_26 = arith.constant 0 : index
    %77 = vector.load %arg2[%c11, %c0_25, %c0_26] : memref<26x8x128xf32, #tpu.memory_space<vmem>>, vector<1x8x128xf32>
    %78 = vector.shape_cast %77 : vector<1x8x128xf32> to vector<8x128xf32>
    %cst_27 = arith.constant 5.000000e-01 : f32
    %79 = vector.broadcast %cst_27 : f32 to vector<8x128xf32>
    %80 = arith.mulf %79, %78 : vector<8x128xf32>
    %81 = math.tanh %80 : vector<8x128xf32>
    %cst_28 = arith.constant 1.000000e+00 : f32
    %82 = vector.broadcast %cst_28 : f32 to vector<8x128xf32>
    %83 = arith.addf %81, %82 : vector<8x128xf32>
    %cst_29 = arith.constant 5.000000e-01 : f32
    %84 = vector.broadcast %cst_29 : f32 to vector<8x128xf32>
    %85 = arith.mulf %84, %83 : vector<8x128xf32>
    %c12 = arith.constant 12 : index
    %c0_30 = arith.constant 0 : index
    %c0_31 = arith.constant 0 : index
    %86 = vector.load %arg2[%c12, %c0_30, %c0_31] : memref<26x8x128xf32, #tpu.memory_space<vmem>>, vector<1x8x128xf32>
    %87 = vector.shape_cast %86 : vector<1x8x128xf32> to vector<8x128xf32>
    %cst_32 = arith.constant 5.000000e-01 : f32
    %88 = vector.broadcast %cst_32 : f32 to vector<8x128xf32>
    %89 = arith.mulf %88, %87 : vector<8x128xf32>
    %90 = math.tanh %89 : vector<8x128xf32>
    %cst_33 = arith.constant 1.000000e+00 : f32
    %91 = vector.broadcast %cst_33 : f32 to vector<8x128xf32>
    %92 = arith.addf %90, %91 : vector<8x128xf32>
    %cst_34 = arith.constant 5.000000e-01 : f32
    %93 = vector.broadcast %cst_34 : f32 to vector<8x128xf32>
    %94 = arith.mulf %93, %92 : vector<8x128xf32>
    %c13 = arith.constant 13 : index
    %c0_35 = arith.constant 0 : index
    %c0_36 = arith.constant 0 : index
    %95 = vector.load %arg2[%c13, %c0_35, %c0_36] : memref<26x8x128xf32, #tpu.memory_space<vmem>>, vector<1x8x128xf32>
    %96 = vector.shape_cast %95 : vector<1x8x128xf32> to vector<8x128xf32>
    %c14 = arith.constant 14 : index
    %c0_37 = arith.constant 0 : index
    %c0_38 = arith.constant 0 : index
    %97 = vector.load %arg2[%c14, %c0_37, %c0_38] : memref<26x8x128xf32, #tpu.memory_space<vmem>>, vector<1x8x128xf32>
    %98 = vector.shape_cast %97 : vector<1x8x128xf32> to vector<8x128xf32>
    %c15 = arith.constant 15 : index
    %c0_39 = arith.constant 0 : index
    %c0_40 = arith.constant 0 : index
    %99 = vector.load %arg2[%c15, %c0_39, %c0_40] : memref<26x8x128xf32, #tpu.memory_space<vmem>>, vector<1x8x128xf32>
    %100 = vector.shape_cast %99 : vector<1x8x128xf32> to vector<8x128xf32>
    %c16 = arith.constant 16 : index
    %c0_41 = arith.constant 0 : index
    %c0_42 = arith.constant 0 : index
    %101 = vector.load %arg2[%c16, %c0_41, %c0_42] : memref<26x8x128xf32, #tpu.memory_space<vmem>>, vector<1x8x128xf32>
    %102 = vector.shape_cast %101 : vector<1x8x128xf32> to vector<8x128xf32>
    %103 = arith.subf %67, %96 : vector<8x128xf32>
    %104 = math.absf %103 : vector<8x128xf32>
    %cst_43 = arith.constant 2.000000e-05 : f32
    %105 = vector.broadcast %cst_43 : f32 to vector<8x128xf32>
    %106 = arith.cmpf olt, %104, %105 : vector<8x128xf32>
    %cst_44 = arith.constant 2.500000e+04 : f32
    %107 = vector.broadcast %cst_44 : f32 to vector<8x128xf32>
    %108 = arith.mulf %107, %104 : vector<8x128xf32>
    %109 = arith.mulf %108, %104 : vector<8x128xf32>
    %cst_45 = arith.constant 9.99999974E-6 : f32
    %110 = vector.broadcast %cst_45 : f32 to vector<8x128xf32>
    %111 = arith.subf %104, %110 : vector<8x128xf32>
    %112 = arith.select %106, %109, %111 : vector<8x128xi1>, vector<8x128xf32>
    %113 = arith.subf %76, %98 : vector<8x128xf32>
    %114 = math.absf %113 : vector<8x128xf32>
    %cst_46 = arith.constant 2.000000e-05 : f32
    %115 = vector.broadcast %cst_46 : f32 to vector<8x128xf32>
    %116 = arith.cmpf olt, %114, %115 : vector<8x128xf32>
    %cst_47 = arith.constant 2.500000e+04 : f32
    %117 = vector.broadcast %cst_47 : f32 to vector<8x128xf32>
    %118 = arith.mulf %117, %114 : vector<8x128xf32>
    %119 = arith.mulf %118, %114 : vector<8x128xf32>
    %cst_48 = arith.constant 9.99999974E-6 : f32
    %120 = vector.broadcast %cst_48 : f32 to vector<8x128xf32>
    %121 = arith.subf %114, %120 : vector<8x128xf32>
    %122 = arith.select %116, %119, %121 : vector<8x128xi1>, vector<8x128xf32>
    %123 = arith.addf %112, %122 : vector<8x128xf32>
    %124 = arith.subf %85, %100 : vector<8x128xf32>
    %125 = math.absf %124 : vector<8x128xf32>
    %cst_49 = arith.constant 2.000000e-05 : f32
    %126 = vector.broadcast %cst_49 : f32 to vector<8x128xf32>
    %127 = arith.cmpf olt, %125, %126 : vector<8x128xf32>
    %cst_50 = arith.constant 2.500000e+04 : f32
    %128 = vector.broadcast %cst_50 : f32 to vector<8x128xf32>
    %129 = arith.mulf %128, %125 : vector<8x128xf32>
    %130 = arith.mulf %129, %125 : vector<8x128xf32>
    %cst_51 = arith.constant 9.99999974E-6 : f32
    %131 = vector.broadcast %cst_51 : f32 to vector<8x128xf32>
    %132 = arith.subf %125, %131 : vector<8x128xf32>
    %133 = arith.select %127, %130, %132 : vector<8x128xi1>, vector<8x128xf32>
    %134 = arith.addf %123, %133 : vector<8x128xf32>
    %135 = arith.subf %94, %102 : vector<8x128xf32>
    %136 = math.absf %135 : vector<8x128xf32>
    %cst_52 = arith.constant 2.000000e-05 : f32
    %137 = vector.broadcast %cst_52 : f32 to vector<8x128xf32>
    %138 = arith.cmpf olt, %136, %137 : vector<8x128xf32>
    %cst_53 = arith.constant 2.500000e+04 : f32
    %139 = vector.broadcast %cst_53 : f32 to vector<8x128xf32>
    %140 = arith.mulf %139, %136 : vector<8x128xf32>
    %141 = arith.mulf %140, %136 : vector<8x128xf32>
    %cst_54 = arith.constant 9.99999974E-6 : f32
    %142 = vector.broadcast %cst_54 : f32 to vector<8x128xf32>
    %143 = arith.subf %136, %142 : vector<8x128xf32>
    %144 = arith.select %138, %141, %143 : vector<8x128xi1>, vector<8x128xf32>
    %145 = arith.addf %134, %144 : vector<8x128xf32>
    %146 = arith.mulf %145, %23 : vector<8x128xf32>
    %cst_55 = arith.constant 5.000000e-01 : f32
    %147 = vector.broadcast %cst_55 : f32 to vector<8x128xf32>
    %148 = arith.mulf %85, %147 : vector<8x128xf32>
    %149 = arith.subf %67, %148 : vector<8x128xf32>
    %cst_56 = arith.constant 5.000000e-01 : f32
    %150 = vector.broadcast %cst_56 : f32 to vector<8x128xf32>
    %151 = arith.mulf %94, %150 : vector<8x128xf32>
    %152 = arith.subf %76, %151 : vector<8x128xf32>
    %cst_57 = arith.constant 5.000000e-01 : f32
    %153 = vector.broadcast %cst_57 : f32 to vector<8x128xf32>
    %154 = arith.mulf %85, %153 : vector<8x128xf32>
    %155 = arith.addf %67, %154 : vector<8x128xf32>
    %cst_58 = arith.constant 5.000000e-01 : f32
    %156 = vector.broadcast %cst_58 : f32 to vector<8x128xf32>
    %157 = arith.mulf %94, %156 : vector<8x128xf32>
    %158 = arith.addf %76, %157 : vector<8x128xf32>
    %cst_59 = arith.constant 5.000000e-01 : f32
    %159 = vector.broadcast %cst_59 : f32 to vector<8x128xf32>
    %160 = arith.mulf %100, %159 : vector<8x128xf32>
    %161 = arith.subf %96, %160 : vector<8x128xf32>
    %cst_60 = arith.constant 5.000000e-01 : f32
    %162 = vector.broadcast %cst_60 : f32 to vector<8x128xf32>
    %163 = arith.mulf %102, %162 : vector<8x128xf32>
    %164 = arith.subf %98, %163 : vector<8x128xf32>
    %cst_61 = arith.constant 5.000000e-01 : f32
    %165 = vector.broadcast %cst_61 : f32 to vector<8x128xf32>
    %166 = arith.mulf %100, %165 : vector<8x128xf32>
    %167 = arith.addf %96, %166 : vector<8x128xf32>
    %cst_62 = arith.constant 5.000000e-01 : f32
    %168 = vector.broadcast %cst_62 : f32 to vector<8x128xf32>
    %169 = arith.mulf %102, %168 : vector<8x128xf32>
    %170 = arith.addf %98, %169 : vector<8x128xf32>
    %171 = arith.maximumf %149, %161 : vector<8x128xf32>
    %172 = arith.maximumf %152, %164 : vector<8x128xf32>
    %173 = arith.minimumf %155, %167 : vector<8x128xf32>
    %174 = arith.minimumf %158, %170 : vector<8x128xf32>
    %175 = arith.cmpf ogt, %174, %172 : vector<8x128xf32>
    %176 = arith.cmpf ogt, %173, %171 : vector<8x128xf32>
    %177 = arith.andi %175, %176 : vector<8x128xi1>
    %178 = arith.subf %173, %171 : vector<8x128xf32>
    %179 = arith.subf %174, %172 : vector<8x128xf32>
    %180 = arith.mulf %178, %179 : vector<8x128xf32>
    %cst_63 = arith.constant 0.000000e+00 : f32
    %181 = vector.broadcast %cst_63 : f32 to vector<8x128xf32>
    %182 = arith.select %177, %180, %181 : vector<8x128xi1>, vector<8x128xf32>
    %183 = arith.subf %155, %149 : vector<8x128xf32>
    %184 = arith.subf %158, %152 : vector<8x128xf32>
    %185 = arith.mulf %183, %184 : vector<8x128xf32>
    %186 = arith.subf %167, %161 : vector<8x128xf32>
    %187 = arith.subf %170, %164 : vector<8x128xf32>
    %188 = arith.mulf %186, %187 : vector<8x128xf32>
    %189 = arith.addf %185, %188 : vector<8x128xf32>
    %190 = arith.subf %189, %182 : vector<8x128xf32>
    %191 = arith.maximumf %155, %167 : vector<8x128xf32>
    %192 = arith.minimumf %149, %161 : vector<8x128xf32>
    %193 = arith.subf %191, %192 : vector<8x128xf32>
    %194 = arith.maximumf %158, %170 : vector<8x128xf32>
    %195 = arith.minimumf %152, %164 : vector<8x128xf32>
    %196 = arith.subf %194, %195 : vector<8x128xf32>
    %197 = arith.mulf %193, %196 : vector<8x128xf32>
    %cst_64 = arith.constant 1.000000e-07 : f32
    %198 = vector.broadcast %cst_64 : f32 to vector<8x128xf32>
    %199 = arith.addf %190, %198 : vector<8x128xf32>
    %200 = arith.divf %182, %199 : vector<8x128xf32>
    %201 = arith.subf %197, %190 : vector<8x128xf32>
    %cst_65 = arith.constant 1.000000e-07 : f32
    %202 = vector.broadcast %cst_65 : f32 to vector<8x128xf32>
    %203 = arith.addf %197, %202 : vector<8x128xf32>
    %204 = arith.divf %201, %203 : vector<8x128xf32>
    %205 = arith.subf %200, %204 : vector<8x128xf32>
    %cst_66 = arith.constant 1.000000e+00 : f32
    %206 = vector.broadcast %cst_66 : f32 to vector<8x128xf32>
    %207 = arith.subf %206, %205 : vector<8x128xf32>
    %208 = arith.mulf %207, %23 : vector<8x128xf32>
    %c1 = arith.constant 1 : index
    %c0_67 = arith.constant 0 : index
    %c0_68 = arith.constant 0 : index
    %209 = vector.load %arg2[%c1, %c0_67, %c0_68] : memref<26x8x128xf32, #tpu.memory_space<vmem>>, vector<1x8x128xf32>
    %210 = vector.shape_cast %209 : vector<1x8x128xf32> to vector<8x128xf32>
    %c18 = arith.constant 18 : index
    %c0_69 = arith.constant 0 : index
    %c0_70 = arith.constant 0 : index
    %211 = vector.load %arg2[%c18, %c0_69, %c0_70] : memref<26x8x128xf32, #tpu.memory_space<vmem>>, vector<1x8x128xf32>
    %212 = vector.shape_cast %211 : vector<1x8x128xf32> to vector<8x128xf32>
    %cst_71 = arith.constant 5.000000e-01 : f32
    %213 = vector.broadcast %cst_71 : f32 to vector<8x128xf32>
    %214 = arith.mulf %213, %210 : vector<8x128xf32>
    %215 = math.tanh %214 : vector<8x128xf32>
    %cst_72 = arith.constant 1.000000e+00 : f32
    %216 = vector.broadcast %cst_72 : f32 to vector<8x128xf32>
    %217 = arith.addf %215, %216 : vector<8x128xf32>
    %cst_73 = arith.constant 5.000000e-01 : f32
    %218 = vector.broadcast %cst_73 : f32 to vector<8x128xf32>
    %219 = arith.mulf %218, %217 : vector<8x128xf32>
    %cst_74 = arith.constant 0.000000e+00 : f32
    %220 = vector.broadcast %cst_74 : f32 to vector<8x128xf32>
    %221 = arith.maximumf %210, %220 : vector<8x128xf32>
    %222 = arith.mulf %210, %212 : vector<8x128xf32>
    %223 = arith.subf %221, %222 : vector<8x128xf32>
    %cst_75 = arith.constant 1.000000e+00 : f32
    %224 = vector.broadcast %cst_75 : f32 to vector<8x128xf32>
    %225 = arith.subf %224, %219 : vector<8x128xf32>
    %226 = arith.maximumf %219, %225 : vector<8x128xf32>
    %227 = math.log %226 : vector<8x128xf32>
    %cst_76 = arith.constant 0.000000e+00 : f32
    %228 = vector.broadcast %cst_76 : f32 to vector<8x128xf32>
    %229 = arith.subf %228, %227 : vector<8x128xf32>
    %230 = arith.addf %223, %229 : vector<8x128xf32>
    %231 = arith.mulf %219, %212 : vector<8x128xf32>
    %cst_77 = arith.constant 1.000000e+00 : f32
    %232 = vector.broadcast %cst_77 : f32 to vector<8x128xf32>
    %233 = arith.subf %232, %219 : vector<8x128xf32>
    %cst_78 = arith.constant 1.000000e+00 : f32
    %234 = vector.broadcast %cst_78 : f32 to vector<8x128xf32>
    %235 = arith.subf %234, %212 : vector<8x128xf32>
    %236 = arith.mulf %233, %235 : vector<8x128xf32>
    %237 = arith.addf %231, %236 : vector<8x128xf32>
    %cst_79 = arith.constant 2.500000e-01 : f32
    %238 = vector.broadcast %cst_79 : f32 to vector<8x128xf32>
    %239 = arith.mulf %238, %212 : vector<8x128xf32>
    %cst_80 = arith.constant 1.000000e+00 : f32
    %240 = vector.broadcast %cst_80 : f32 to vector<8x128xf32>
    %241 = arith.subf %240, %212 : vector<8x128xf32>
    %cst_81 = arith.constant 7.500000e-01 : f32
    %242 = vector.broadcast %cst_81 : f32 to vector<8x128xf32>
    %243 = arith.mulf %242, %241 : vector<8x128xf32>
    %244 = arith.addf %239, %243 : vector<8x128xf32>
    %245 = arith.mulf %244, %230 : vector<8x128xf32>
    %cst_82 = arith.constant 1.000000e+00 : f32
    %246 = vector.broadcast %cst_82 : f32 to vector<8x128xf32>
    %247 = arith.subf %246, %237 : vector<8x128xf32>
    %248 = arith.mulf %247, %247 : vector<8x128xf32>
    %249 = arith.mulf %245, %248 : vector<8x128xf32>
    %250 = arith.mulf %219, %219 : vector<8x128xf32>
    %c2 = arith.constant 2 : index
    %c0_83 = arith.constant 0 : index
    %c0_84 = arith.constant 0 : index
    %251 = vector.load %arg2[%c2, %c0_83, %c0_84] : memref<26x8x128xf32, #tpu.memory_space<vmem>>, vector<1x8x128xf32>
    %252 = vector.shape_cast %251 : vector<1x8x128xf32> to vector<8x128xf32>
    %c19 = arith.constant 19 : index
    %c0_85 = arith.constant 0 : index
    %c0_86 = arith.constant 0 : index
    %253 = vector.load %arg2[%c19, %c0_85, %c0_86] : memref<26x8x128xf32, #tpu.memory_space<vmem>>, vector<1x8x128xf32>
    %254 = vector.shape_cast %253 : vector<1x8x128xf32> to vector<8x128xf32>
    %cst_87 = arith.constant 5.000000e-01 : f32
    %255 = vector.broadcast %cst_87 : f32 to vector<8x128xf32>
    %256 = arith.mulf %255, %252 : vector<8x128xf32>
    %257 = math.tanh %256 : vector<8x128xf32>
    %cst_88 = arith.constant 1.000000e+00 : f32
    %258 = vector.broadcast %cst_88 : f32 to vector<8x128xf32>
    %259 = arith.addf %257, %258 : vector<8x128xf32>
    %cst_89 = arith.constant 5.000000e-01 : f32
    %260 = vector.broadcast %cst_89 : f32 to vector<8x128xf32>
    %261 = arith.mulf %260, %259 : vector<8x128xf32>
    %cst_90 = arith.constant 0.000000e+00 : f32
    %262 = vector.broadcast %cst_90 : f32 to vector<8x128xf32>
    %263 = arith.maximumf %252, %262 : vector<8x128xf32>
    %264 = arith.mulf %252, %254 : vector<8x128xf32>
    %265 = arith.subf %263, %264 : vector<8x128xf32>
    %cst_91 = arith.constant 1.000000e+00 : f32
    %266 = vector.broadcast %cst_91 : f32 to vector<8x128xf32>
    %267 = arith.subf %266, %261 : vector<8x128xf32>
    %268 = arith.maximumf %261, %267 : vector<8x128xf32>
    %269 = math.log %268 : vector<8x128xf32>
    %cst_92 = arith.constant 0.000000e+00 : f32
    %270 = vector.broadcast %cst_92 : f32 to vector<8x128xf32>
    %271 = arith.subf %270, %269 : vector<8x128xf32>
    %272 = arith.addf %265, %271 : vector<8x128xf32>
    %273 = arith.mulf %261, %254 : vector<8x128xf32>
    %cst_93 = arith.constant 1.000000e+00 : f32
    %274 = vector.broadcast %cst_93 : f32 to vector<8x128xf32>
    %275 = arith.subf %274, %261 : vector<8x128xf32>
    %cst_94 = arith.constant 1.000000e+00 : f32
    %276 = vector.broadcast %cst_94 : f32 to vector<8x128xf32>
    %277 = arith.subf %276, %254 : vector<8x128xf32>
    %278 = arith.mulf %275, %277 : vector<8x128xf32>
    %279 = arith.addf %273, %278 : vector<8x128xf32>
    %cst_95 = arith.constant 2.500000e-01 : f32
    %280 = vector.broadcast %cst_95 : f32 to vector<8x128xf32>
    %281 = arith.mulf %280, %254 : vector<8x128xf32>
    %cst_96 = arith.constant 1.000000e+00 : f32
    %282 = vector.broadcast %cst_96 : f32 to vector<8x128xf32>
    %283 = arith.subf %282, %254 : vector<8x128xf32>
    %cst_97 = arith.constant 7.500000e-01 : f32
    %284 = vector.broadcast %cst_97 : f32 to vector<8x128xf32>
    %285 = arith.mulf %284, %283 : vector<8x128xf32>
    %286 = arith.addf %281, %285 : vector<8x128xf32>
    %287 = arith.mulf %286, %272 : vector<8x128xf32>
    %cst_98 = arith.constant 1.000000e+00 : f32
    %288 = vector.broadcast %cst_98 : f32 to vector<8x128xf32>
    %289 = arith.subf %288, %279 : vector<8x128xf32>
    %290 = arith.mulf %289, %289 : vector<8x128xf32>
    %291 = arith.mulf %287, %290 : vector<8x128xf32>
    %292 = arith.mulf %261, %261 : vector<8x128xf32>
    %293 = arith.addf %249, %291 : vector<8x128xf32>
    %294 = arith.addf %250, %292 : vector<8x128xf32>
    %c3 = arith.constant 3 : index
    %c0_99 = arith.constant 0 : index
    %c0_100 = arith.constant 0 : index
    %295 = vector.load %arg2[%c3, %c0_99, %c0_100] : memref<26x8x128xf32, #tpu.memory_space<vmem>>, vector<1x8x128xf32>
    %296 = vector.shape_cast %295 : vector<1x8x128xf32> to vector<8x128xf32>
    %c20 = arith.constant 20 : index
    %c0_101 = arith.constant 0 : index
    %c0_102 = arith.constant 0 : index
    %297 = vector.load %arg2[%c20, %c0_101, %c0_102] : memref<26x8x128xf32, #tpu.memory_space<vmem>>, vector<1x8x128xf32>
    %298 = vector.shape_cast %297 : vector<1x8x128xf32> to vector<8x128xf32>
    %cst_103 = arith.constant 5.000000e-01 : f32
    %299 = vector.broadcast %cst_103 : f32 to vector<8x128xf32>
    %300 = arith.mulf %299, %296 : vector<8x128xf32>
    %301 = math.tanh %300 : vector<8x128xf32>
    %cst_104 = arith.constant 1.000000e+00 : f32
    %302 = vector.broadcast %cst_104 : f32 to vector<8x128xf32>
    %303 = arith.addf %301, %302 : vector<8x128xf32>
    %cst_105 = arith.constant 5.000000e-01 : f32
    %304 = vector.broadcast %cst_105 : f32 to vector<8x128xf32>
    %305 = arith.mulf %304, %303 : vector<8x128xf32>
    %cst_106 = arith.constant 0.000000e+00 : f32
    %306 = vector.broadcast %cst_106 : f32 to vector<8x128xf32>
    %307 = arith.maximumf %296, %306 : vector<8x128xf32>
    %308 = arith.mulf %296, %298 : vector<8x128xf32>
    %309 = arith.subf %307, %308 : vector<8x128xf32>
    %cst_107 = arith.constant 1.000000e+00 : f32
    %310 = vector.broadcast %cst_107 : f32 to vector<8x128xf32>
    %311 = arith.subf %310, %305 : vector<8x128xf32>
    %312 = arith.maximumf %305, %311 : vector<8x128xf32>
    %313 = math.log %312 : vector<8x128xf32>
    %cst_108 = arith.constant 0.000000e+00 : f32
    %314 = vector.broadcast %cst_108 : f32 to vector<8x128xf32>
    %315 = arith.subf %314, %313 : vector<8x128xf32>
    %316 = arith.addf %309, %315 : vector<8x128xf32>
    %317 = arith.mulf %305, %298 : vector<8x128xf32>
    %cst_109 = arith.constant 1.000000e+00 : f32
    %318 = vector.broadcast %cst_109 : f32 to vector<8x128xf32>
    %319 = arith.subf %318, %305 : vector<8x128xf32>
    %cst_110 = arith.constant 1.000000e+00 : f32
    %320 = vector.broadcast %cst_110 : f32 to vector<8x128xf32>
    %321 = arith.subf %320, %298 : vector<8x128xf32>
    %322 = arith.mulf %319, %321 : vector<8x128xf32>
    %323 = arith.addf %317, %322 : vector<8x128xf32>
    %cst_111 = arith.constant 2.500000e-01 : f32
    %324 = vector.broadcast %cst_111 : f32 to vector<8x128xf32>
    %325 = arith.mulf %324, %298 : vector<8x128xf32>
    %cst_112 = arith.constant 1.000000e+00 : f32
    %326 = vector.broadcast %cst_112 : f32 to vector<8x128xf32>
    %327 = arith.subf %326, %298 : vector<8x128xf32>
    %cst_113 = arith.constant 7.500000e-01 : f32
    %328 = vector.broadcast %cst_113 : f32 to vector<8x128xf32>
    %329 = arith.mulf %328, %327 : vector<8x128xf32>
    %330 = arith.addf %325, %329 : vector<8x128xf32>
    %331 = arith.mulf %330, %316 : vector<8x128xf32>
    %cst_114 = arith.constant 1.000000e+00 : f32
    %332 = vector.broadcast %cst_114 : f32 to vector<8x128xf32>
    %333 = arith.subf %332, %323 : vector<8x128xf32>
    %334 = arith.mulf %333, %333 : vector<8x128xf32>
    %335 = arith.mulf %331, %334 : vector<8x128xf32>
    %336 = arith.mulf %305, %305 : vector<8x128xf32>
    %337 = arith.addf %293, %335 : vector<8x128xf32>
    %338 = arith.addf %294, %336 : vector<8x128xf32>
    %c4 = arith.constant 4 : index
    %c0_115 = arith.constant 0 : index
    %c0_116 = arith.constant 0 : index
    %339 = vector.load %arg2[%c4, %c0_115, %c0_116] : memref<26x8x128xf32, #tpu.memory_space<vmem>>, vector<1x8x128xf32>
    %340 = vector.shape_cast %339 : vector<1x8x128xf32> to vector<8x128xf32>
    %c21 = arith.constant 21 : index
    %c0_117 = arith.constant 0 : index
    %c0_118 = arith.constant 0 : index
    %341 = vector.load %arg2[%c21, %c0_117, %c0_118] : memref<26x8x128xf32, #tpu.memory_space<vmem>>, vector<1x8x128xf32>
    %342 = vector.shape_cast %341 : vector<1x8x128xf32> to vector<8x128xf32>
    %cst_119 = arith.constant 5.000000e-01 : f32
    %343 = vector.broadcast %cst_119 : f32 to vector<8x128xf32>
    %344 = arith.mulf %343, %340 : vector<8x128xf32>
    %345 = math.tanh %344 : vector<8x128xf32>
    %cst_120 = arith.constant 1.000000e+00 : f32
    %346 = vector.broadcast %cst_120 : f32 to vector<8x128xf32>
    %347 = arith.addf %345, %346 : vector<8x128xf32>
    %cst_121 = arith.constant 5.000000e-01 : f32
    %348 = vector.broadcast %cst_121 : f32 to vector<8x128xf32>
    %349 = arith.mulf %348, %347 : vector<8x128xf32>
    %cst_122 = arith.constant 0.000000e+00 : f32
    %350 = vector.broadcast %cst_122 : f32 to vector<8x128xf32>
    %351 = arith.maximumf %340, %350 : vector<8x128xf32>
    %352 = arith.mulf %340, %342 : vector<8x128xf32>
    %353 = arith.subf %351, %352 : vector<8x128xf32>
    %cst_123 = arith.constant 1.000000e+00 : f32
    %354 = vector.broadcast %cst_123 : f32 to vector<8x128xf32>
    %355 = arith.subf %354, %349 : vector<8x128xf32>
    %356 = arith.maximumf %349, %355 : vector<8x128xf32>
    %357 = math.log %356 : vector<8x128xf32>
    %cst_124 = arith.constant 0.000000e+00 : f32
    %358 = vector.broadcast %cst_124 : f32 to vector<8x128xf32>
    %359 = arith.subf %358, %357 : vector<8x128xf32>
    %360 = arith.addf %353, %359 : vector<8x128xf32>
    %361 = arith.mulf %349, %342 : vector<8x128xf32>
    %cst_125 = arith.constant 1.000000e+00 : f32
    %362 = vector.broadcast %cst_125 : f32 to vector<8x128xf32>
    %363 = arith.subf %362, %349 : vector<8x128xf32>
    %cst_126 = arith.constant 1.000000e+00 : f32
    %364 = vector.broadcast %cst_126 : f32 to vector<8x128xf32>
    %365 = arith.subf %364, %342 : vector<8x128xf32>
    %366 = arith.mulf %363, %365 : vector<8x128xf32>
    %367 = arith.addf %361, %366 : vector<8x128xf32>
    %cst_127 = arith.constant 2.500000e-01 : f32
    %368 = vector.broadcast %cst_127 : f32 to vector<8x128xf32>
    %369 = arith.mulf %368, %342 : vector<8x128xf32>
    %cst_128 = arith.constant 1.000000e+00 : f32
    %370 = vector.broadcast %cst_128 : f32 to vector<8x128xf32>
    %371 = arith.subf %370, %342 : vector<8x128xf32>
    %cst_129 = arith.constant 7.500000e-01 : f32
    %372 = vector.broadcast %cst_129 : f32 to vector<8x128xf32>
    %373 = arith.mulf %372, %371 : vector<8x128xf32>
    %374 = arith.addf %369, %373 : vector<8x128xf32>
    %375 = arith.mulf %374, %360 : vector<8x128xf32>
    %cst_130 = arith.constant 1.000000e+00 : f32
    %376 = vector.broadcast %cst_130 : f32 to vector<8x128xf32>
    %377 = arith.subf %376, %367 : vector<8x128xf32>
    %378 = arith.mulf %377, %377 : vector<8x128xf32>
    %379 = arith.mulf %375, %378 : vector<8x128xf32>
    %380 = arith.mulf %349, %349 : vector<8x128xf32>
    %381 = arith.addf %337, %379 : vector<8x128xf32>
    %382 = arith.addf %338, %380 : vector<8x128xf32>
    %c5 = arith.constant 5 : index
    %c0_131 = arith.constant 0 : index
    %c0_132 = arith.constant 0 : index
    %383 = vector.load %arg2[%c5, %c0_131, %c0_132] : memref<26x8x128xf32, #tpu.memory_space<vmem>>, vector<1x8x128xf32>
    %384 = vector.shape_cast %383 : vector<1x8x128xf32> to vector<8x128xf32>
    %c22 = arith.constant 22 : index
    %c0_133 = arith.constant 0 : index
    %c0_134 = arith.constant 0 : index
    %385 = vector.load %arg2[%c22, %c0_133, %c0_134] : memref<26x8x128xf32, #tpu.memory_space<vmem>>, vector<1x8x128xf32>
    %386 = vector.shape_cast %385 : vector<1x8x128xf32> to vector<8x128xf32>
    %cst_135 = arith.constant 5.000000e-01 : f32
    %387 = vector.broadcast %cst_135 : f32 to vector<8x128xf32>
    %388 = arith.mulf %387, %384 : vector<8x128xf32>
    %389 = math.tanh %388 : vector<8x128xf32>
    %cst_136 = arith.constant 1.000000e+00 : f32
    %390 = vector.broadcast %cst_136 : f32 to vector<8x128xf32>
    %391 = arith.addf %389, %390 : vector<8x128xf32>
    %cst_137 = arith.constant 5.000000e-01 : f32
    %392 = vector.broadcast %cst_137 : f32 to vector<8x128xf32>
    %393 = arith.mulf %392, %391 : vector<8x128xf32>
    %cst_138 = arith.constant 0.000000e+00 : f32
    %394 = vector.broadcast %cst_138 : f32 to vector<8x128xf32>
    %395 = arith.maximumf %384, %394 : vector<8x128xf32>
    %396 = arith.mulf %384, %386 : vector<8x128xf32>
    %397 = arith.subf %395, %396 : vector<8x128xf32>
    %cst_139 = arith.constant 1.000000e+00 : f32
    %398 = vector.broadcast %cst_139 : f32 to vector<8x128xf32>
    %399 = arith.subf %398, %393 : vector<8x128xf32>
    %400 = arith.maximumf %393, %399 : vector<8x128xf32>
    %401 = math.log %400 : vector<8x128xf32>
    %cst_140 = arith.constant 0.000000e+00 : f32
    %402 = vector.broadcast %cst_140 : f32 to vector<8x128xf32>
    %403 = arith.subf %402, %401 : vector<8x128xf32>
    %404 = arith.addf %397, %403 : vector<8x128xf32>
    %405 = arith.mulf %393, %386 : vector<8x128xf32>
    %cst_141 = arith.constant 1.000000e+00 : f32
    %406 = vector.broadcast %cst_141 : f32 to vector<8x128xf32>
    %407 = arith.subf %406, %393 : vector<8x128xf32>
    %cst_142 = arith.constant 1.000000e+00 : f32
    %408 = vector.broadcast %cst_142 : f32 to vector<8x128xf32>
    %409 = arith.subf %408, %386 : vector<8x128xf32>
    %410 = arith.mulf %407, %409 : vector<8x128xf32>
    %411 = arith.addf %405, %410 : vector<8x128xf32>
    %cst_143 = arith.constant 2.500000e-01 : f32
    %412 = vector.broadcast %cst_143 : f32 to vector<8x128xf32>
    %413 = arith.mulf %412, %386 : vector<8x128xf32>
    %cst_144 = arith.constant 1.000000e+00 : f32
    %414 = vector.broadcast %cst_144 : f32 to vector<8x128xf32>
    %415 = arith.subf %414, %386 : vector<8x128xf32>
    %cst_145 = arith.constant 7.500000e-01 : f32
    %416 = vector.broadcast %cst_145 : f32 to vector<8x128xf32>
    %417 = arith.mulf %416, %415 : vector<8x128xf32>
    %418 = arith.addf %413, %417 : vector<8x128xf32>
    %419 = arith.mulf %418, %404 : vector<8x128xf32>
    %cst_146 = arith.constant 1.000000e+00 : f32
    %420 = vector.broadcast %cst_146 : f32 to vector<8x128xf32>
    %421 = arith.subf %420, %411 : vector<8x128xf32>
    %422 = arith.mulf %421, %421 : vector<8x128xf32>
    %423 = arith.mulf %419, %422 : vector<8x128xf32>
    %424 = arith.mulf %393, %393 : vector<8x128xf32>
    %425 = arith.addf %381, %423 : vector<8x128xf32>
    %426 = arith.addf %382, %424 : vector<8x128xf32>
    %c6 = arith.constant 6 : index
    %c0_147 = arith.constant 0 : index
    %c0_148 = arith.constant 0 : index
    %427 = vector.load %arg2[%c6, %c0_147, %c0_148] : memref<26x8x128xf32, #tpu.memory_space<vmem>>, vector<1x8x128xf32>
    %428 = vector.shape_cast %427 : vector<1x8x128xf32> to vector<8x128xf32>
    %c23 = arith.constant 23 : index
    %c0_149 = arith.constant 0 : index
    %c0_150 = arith.constant 0 : index
    %429 = vector.load %arg2[%c23, %c0_149, %c0_150] : memref<26x8x128xf32, #tpu.memory_space<vmem>>, vector<1x8x128xf32>
    %430 = vector.shape_cast %429 : vector<1x8x128xf32> to vector<8x128xf32>
    %cst_151 = arith.constant 5.000000e-01 : f32
    %431 = vector.broadcast %cst_151 : f32 to vector<8x128xf32>
    %432 = arith.mulf %431, %428 : vector<8x128xf32>
    %433 = math.tanh %432 : vector<8x128xf32>
    %cst_152 = arith.constant 1.000000e+00 : f32
    %434 = vector.broadcast %cst_152 : f32 to vector<8x128xf32>
    %435 = arith.addf %433, %434 : vector<8x128xf32>
    %cst_153 = arith.constant 5.000000e-01 : f32
    %436 = vector.broadcast %cst_153 : f32 to vector<8x128xf32>
    %437 = arith.mulf %436, %435 : vector<8x128xf32>
    %cst_154 = arith.constant 0.000000e+00 : f32
    %438 = vector.broadcast %cst_154 : f32 to vector<8x128xf32>
    %439 = arith.maximumf %428, %438 : vector<8x128xf32>
    %440 = arith.mulf %428, %430 : vector<8x128xf32>
    %441 = arith.subf %439, %440 : vector<8x128xf32>
    %cst_155 = arith.constant 1.000000e+00 : f32
    %442 = vector.broadcast %cst_155 : f32 to vector<8x128xf32>
    %443 = arith.subf %442, %437 : vector<8x128xf32>
    %444 = arith.maximumf %437, %443 : vector<8x128xf32>
    %445 = math.log %444 : vector<8x128xf32>
    %cst_156 = arith.constant 0.000000e+00 : f32
    %446 = vector.broadcast %cst_156 : f32 to vector<8x128xf32>
    %447 = arith.subf %446, %445 : vector<8x128xf32>
    %448 = arith.addf %441, %447 : vector<8x128xf32>
    %449 = arith.mulf %437, %430 : vector<8x128xf32>
    %cst_157 = arith.constant 1.000000e+00 : f32
    %450 = vector.broadcast %cst_157 : f32 to vector<8x128xf32>
    %451 = arith.subf %450, %437 : vector<8x128xf32>
    %cst_158 = arith.constant 1.000000e+00 : f32
    %452 = vector.broadcast %cst_158 : f32 to vector<8x128xf32>
    %453 = arith.subf %452, %430 : vector<8x128xf32>
    %454 = arith.mulf %451, %453 : vector<8x128xf32>
    %455 = arith.addf %449, %454 : vector<8x128xf32>
    %cst_159 = arith.constant 2.500000e-01 : f32
    %456 = vector.broadcast %cst_159 : f32 to vector<8x128xf32>
    %457 = arith.mulf %456, %430 : vector<8x128xf32>
    %cst_160 = arith.constant 1.000000e+00 : f32
    %458 = vector.broadcast %cst_160 : f32 to vector<8x128xf32>
    %459 = arith.subf %458, %430 : vector<8x128xf32>
    %cst_161 = arith.constant 7.500000e-01 : f32
    %460 = vector.broadcast %cst_161 : f32 to vector<8x128xf32>
    %461 = arith.mulf %460, %459 : vector<8x128xf32>
    %462 = arith.addf %457, %461 : vector<8x128xf32>
    %463 = arith.mulf %462, %448 : vector<8x128xf32>
    %cst_162 = arith.constant 1.000000e+00 : f32
    %464 = vector.broadcast %cst_162 : f32 to vector<8x128xf32>
    %465 = arith.subf %464, %455 : vector<8x128xf32>
    %466 = arith.mulf %465, %465 : vector<8x128xf32>
    %467 = arith.mulf %463, %466 : vector<8x128xf32>
    %468 = arith.mulf %437, %437 : vector<8x128xf32>
    %469 = arith.addf %425, %467 : vector<8x128xf32>
    %470 = arith.addf %426, %468 : vector<8x128xf32>
    %c7 = arith.constant 7 : index
    %c0_163 = arith.constant 0 : index
    %c0_164 = arith.constant 0 : index
    %471 = vector.load %arg2[%c7, %c0_163, %c0_164] : memref<26x8x128xf32, #tpu.memory_space<vmem>>, vector<1x8x128xf32>
    %472 = vector.shape_cast %471 : vector<1x8x128xf32> to vector<8x128xf32>
    %c24 = arith.constant 24 : index
    %c0_165 = arith.constant 0 : index
    %c0_166 = arith.constant 0 : index
    %473 = vector.load %arg2[%c24, %c0_165, %c0_166] : memref<26x8x128xf32, #tpu.memory_space<vmem>>, vector<1x8x128xf32>
    %474 = vector.shape_cast %473 : vector<1x8x128xf32> to vector<8x128xf32>
    %cst_167 = arith.constant 5.000000e-01 : f32
    %475 = vector.broadcast %cst_167 : f32 to vector<8x128xf32>
    %476 = arith.mulf %475, %472 : vector<8x128xf32>
    %477 = math.tanh %476 : vector<8x128xf32>
    %cst_168 = arith.constant 1.000000e+00 : f32
    %478 = vector.broadcast %cst_168 : f32 to vector<8x128xf32>
    %479 = arith.addf %477, %478 : vector<8x128xf32>
    %cst_169 = arith.constant 5.000000e-01 : f32
    %480 = vector.broadcast %cst_169 : f32 to vector<8x128xf32>
    %481 = arith.mulf %480, %479 : vector<8x128xf32>
    %cst_170 = arith.constant 0.000000e+00 : f32
    %482 = vector.broadcast %cst_170 : f32 to vector<8x128xf32>
    %483 = arith.maximumf %472, %482 : vector<8x128xf32>
    %484 = arith.mulf %472, %474 : vector<8x128xf32>
    %485 = arith.subf %483, %484 : vector<8x128xf32>
    %cst_171 = arith.constant 1.000000e+00 : f32
    %486 = vector.broadcast %cst_171 : f32 to vector<8x128xf32>
    %487 = arith.subf %486, %481 : vector<8x128xf32>
    %488 = arith.maximumf %481, %487 : vector<8x128xf32>
    %489 = math.log %488 : vector<8x128xf32>
    %cst_172 = arith.constant 0.000000e+00 : f32
    %490 = vector.broadcast %cst_172 : f32 to vector<8x128xf32>
    %491 = arith.subf %490, %489 : vector<8x128xf32>
    %492 = arith.addf %485, %491 : vector<8x128xf32>
    %493 = arith.mulf %481, %474 : vector<8x128xf32>
    %cst_173 = arith.constant 1.000000e+00 : f32
    %494 = vector.broadcast %cst_173 : f32 to vector<8x128xf32>
    %495 = arith.subf %494, %481 : vector<8x128xf32>
    %cst_174 = arith.constant 1.000000e+00 : f32
    %496 = vector.broadcast %cst_174 : f32 to vector<8x128xf32>
    %497 = arith.subf %496, %474 : vector<8x128xf32>
    %498 = arith.mulf %495, %497 : vector<8x128xf32>
    %499 = arith.addf %493, %498 : vector<8x128xf32>
    %cst_175 = arith.constant 2.500000e-01 : f32
    %500 = vector.broadcast %cst_175 : f32 to vector<8x128xf32>
    %501 = arith.mulf %500, %474 : vector<8x128xf32>
    %cst_176 = arith.constant 1.000000e+00 : f32
    %502 = vector.broadcast %cst_176 : f32 to vector<8x128xf32>
    %503 = arith.subf %502, %474 : vector<8x128xf32>
    %cst_177 = arith.constant 7.500000e-01 : f32
    %504 = vector.broadcast %cst_177 : f32 to vector<8x128xf32>
    %505 = arith.mulf %504, %503 : vector<8x128xf32>
    %506 = arith.addf %501, %505 : vector<8x128xf32>
    %507 = arith.mulf %506, %492 : vector<8x128xf32>
    %cst_178 = arith.constant 1.000000e+00 : f32
    %508 = vector.broadcast %cst_178 : f32 to vector<8x128xf32>
    %509 = arith.subf %508, %499 : vector<8x128xf32>
    %510 = arith.mulf %509, %509 : vector<8x128xf32>
    %511 = arith.mulf %507, %510 : vector<8x128xf32>
    %512 = arith.mulf %481, %481 : vector<8x128xf32>
    %513 = arith.addf %469, %511 : vector<8x128xf32>
    %514 = arith.addf %470, %512 : vector<8x128xf32>
    %c8 = arith.constant 8 : index
    %c0_179 = arith.constant 0 : index
    %c0_180 = arith.constant 0 : index
    %515 = vector.load %arg2[%c8, %c0_179, %c0_180] : memref<26x8x128xf32, #tpu.memory_space<vmem>>, vector<1x8x128xf32>
    %516 = vector.shape_cast %515 : vector<1x8x128xf32> to vector<8x128xf32>
    %c25 = arith.constant 25 : index
    %c0_181 = arith.constant 0 : index
    %c0_182 = arith.constant 0 : index
    %517 = vector.load %arg2[%c25, %c0_181, %c0_182] : memref<26x8x128xf32, #tpu.memory_space<vmem>>, vector<1x8x128xf32>
    %518 = vector.shape_cast %517 : vector<1x8x128xf32> to vector<8x128xf32>
    %cst_183 = arith.constant 5.000000e-01 : f32
    %519 = vector.broadcast %cst_183 : f32 to vector<8x128xf32>
    %520 = arith.mulf %519, %516 : vector<8x128xf32>
    %521 = math.tanh %520 : vector<8x128xf32>
    %cst_184 = arith.constant 1.000000e+00 : f32
    %522 = vector.broadcast %cst_184 : f32 to vector<8x128xf32>
    %523 = arith.addf %521, %522 : vector<8x128xf32>
    %cst_185 = arith.constant 5.000000e-01 : f32
    %524 = vector.broadcast %cst_185 : f32 to vector<8x128xf32>
    %525 = arith.mulf %524, %523 : vector<8x128xf32>
    %cst_186 = arith.constant 0.000000e+00 : f32
    %526 = vector.broadcast %cst_186 : f32 to vector<8x128xf32>
    %527 = arith.maximumf %516, %526 : vector<8x128xf32>
    %528 = arith.mulf %516, %518 : vector<8x128xf32>
    %529 = arith.subf %527, %528 : vector<8x128xf32>
    %cst_187 = arith.constant 1.000000e+00 : f32
    %530 = vector.broadcast %cst_187 : f32 to vector<8x128xf32>
    %531 = arith.subf %530, %525 : vector<8x128xf32>
    %532 = arith.maximumf %525, %531 : vector<8x128xf32>
    %533 = math.log %532 : vector<8x128xf32>
    %cst_188 = arith.constant 0.000000e+00 : f32
    %534 = vector.broadcast %cst_188 : f32 to vector<8x128xf32>
    %535 = arith.subf %534, %533 : vector<8x128xf32>
    %536 = arith.addf %529, %535 : vector<8x128xf32>
    %537 = arith.mulf %525, %518 : vector<8x128xf32>
    %cst_189 = arith.constant 1.000000e+00 : f32
    %538 = vector.broadcast %cst_189 : f32 to vector<8x128xf32>
    %539 = arith.subf %538, %525 : vector<8x128xf32>
    %cst_190 = arith.constant 1.000000e+00 : f32
    %540 = vector.broadcast %cst_190 : f32 to vector<8x128xf32>
    %541 = arith.subf %540, %518 : vector<8x128xf32>
    %542 = arith.mulf %539, %541 : vector<8x128xf32>
    %543 = arith.addf %537, %542 : vector<8x128xf32>
    %cst_191 = arith.constant 2.500000e-01 : f32
    %544 = vector.broadcast %cst_191 : f32 to vector<8x128xf32>
    %545 = arith.mulf %544, %518 : vector<8x128xf32>
    %cst_192 = arith.constant 1.000000e+00 : f32
    %546 = vector.broadcast %cst_192 : f32 to vector<8x128xf32>
    %547 = arith.subf %546, %518 : vector<8x128xf32>
    %cst_193 = arith.constant 7.500000e-01 : f32
    %548 = vector.broadcast %cst_193 : f32 to vector<8x128xf32>
    %549 = arith.mulf %548, %547 : vector<8x128xf32>
    %550 = arith.addf %545, %549 : vector<8x128xf32>
    %551 = arith.mulf %550, %536 : vector<8x128xf32>
    %cst_194 = arith.constant 1.000000e+00 : f32
    %552 = vector.broadcast %cst_194 : f32 to vector<8x128xf32>
    %553 = arith.subf %552, %543 : vector<8x128xf32>
    %554 = arith.mulf %553, %553 : vector<8x128xf32>
    %555 = arith.mulf %551, %554 : vector<8x128xf32>
    %556 = arith.mulf %525, %525 : vector<8x128xf32>
    %557 = arith.addf %513, %555 : vector<8x128xf32>
    %558 = arith.addf %514, %556 : vector<8x128xf32>
    %559 = arith.mulf %557, %23 : vector<8x128xf32>
    %560 = arith.mulf %558, %26 : vector<8x128xf32>
    %c0_195 = arith.constant 0 : index
    %c0_196 = arith.constant 0 : index
    %c0_197 = arith.constant 0 : index
    %c0_198 = arith.constant 0 : index
    %561 = vector.load %arg3[%c0_195, %c0_196, %c0_197, %c0_198] : memref<1x6x8x128xf32, #tpu.memory_space<vmem>>, vector<1x1x8x128xf32>
    %562 = vector.shape_cast %561 : vector<1x1x8x128xf32> to vector<8x128xf32>
    %563 = arith.addf %562, %53 : vector<8x128xf32>
    %c0_199 = arith.constant 0 : index
    %c0_200 = arith.constant 0 : index
    %c0_201 = arith.constant 0 : index
    %c0_202 = arith.constant 0 : index
    %564 = vector.load %arg3[%c0_199, %c0_200, %c0_201, %c0_202] : memref<1x6x8x128xf32, #tpu.memory_space<vmem>>, vector<1x1x8x128xf32>
    %565 = vector.shape_cast %564 : vector<1x1x8x128xf32> to vector<8x128xf32>
    %566 = vector.shape_cast %563 : vector<8x128xf32> to vector<1x1x8x128xf32>
    tpu.vector_store %arg3[%c0_199, %c0_200, %c0_201, %c0_202], %566 {strides = array<i32>} : memref<1x6x8x128xf32, #tpu.memory_space<vmem>>, vector<1x1x8x128xf32>,
    %c0_203 = arith.constant 0 : index
    %c1_204 = arith.constant 1 : index
    %c0_205 = arith.constant 0 : index
    %c0_206 = arith.constant 0 : index
    %567 = vector.load %arg3[%c0_203, %c1_204, %c0_205, %c0_206] : memref<1x6x8x128xf32, #tpu.memory_space<vmem>>, vector<1x1x8x128xf32>
    %568 = vector.shape_cast %567 : vector<1x1x8x128xf32> to vector<8x128xf32>
    %569 = arith.addf %568, %58 : vector<8x128xf32>
    %c0_207 = arith.constant 0 : index
    %c1_208 = arith.constant 1 : index
    %c0_209 = arith.constant 0 : index
    %c0_210 = arith.constant 0 : index
    %570 = vector.load %arg3[%c0_207, %c1_208, %c0_209, %c0_210] : memref<1x6x8x128xf32, #tpu.memory_space<vmem>>, vector<1x1x8x128xf32>
    %571 = vector.shape_cast %570 : vector<1x1x8x128xf32> to vector<8x128xf32>
    %572 = vector.shape_cast %569 : vector<8x128xf32> to vector<1x1x8x128xf32>
    tpu.vector_store %arg3[%c0_207, %c1_208, %c0_209, %c0_210], %572 {strides = array<i32>} : memref<1x6x8x128xf32, #tpu.memory_space<vmem>>, vector<1x1x8x128xf32>,
    %c0_211 = arith.constant 0 : index
    %c2_212 = arith.constant 2 : index
    %c0_213 = arith.constant 0 : index
    %c0_214 = arith.constant 0 : index
    %573 = vector.load %arg3[%c0_211, %c2_212, %c0_213, %c0_214] : memref<1x6x8x128xf32, #tpu.memory_space<vmem>>, vector<1x1x8x128xf32>
    %574 = vector.shape_cast %573 : vector<1x1x8x128xf32> to vector<8x128xf32>
    %575 = arith.addf %574, %146 : vector<8x128xf32>
    %c0_215 = arith.constant 0 : index
    %c2_216 = arith.constant 2 : index
    %c0_217 = arith.constant 0 : index
    %c0_218 = arith.constant 0 : index
    %576 = vector.load %arg3[%c0_215, %c2_216, %c0_217, %c0_218] : memref<1x6x8x128xf32, #tpu.memory_space<vmem>>, vector<1x1x8x128xf32>
    %577 = vector.shape_cast %576 : vector<1x1x8x128xf32> to vector<8x128xf32>
    %578 = vector.shape_cast %575 : vector<8x128xf32> to vector<1x1x8x128xf32>
    tpu.vector_store %arg3[%c0_215, %c2_216, %c0_217, %c0_218], %578 {strides = array<i32>} : memref<1x6x8x128xf32, #tpu.memory_space<vmem>>, vector<1x1x8x128xf32>,
    %c0_219 = arith.constant 0 : index
    %c3_220 = arith.constant 3 : index
    %c0_221 = arith.constant 0 : index
    %c0_222 = arith.constant 0 : index
    %579 = vector.load %arg3[%c0_219, %c3_220, %c0_221, %c0_222] : memref<1x6x8x128xf32, #tpu.memory_space<vmem>>, vector<1x1x8x128xf32>
    %580 = vector.shape_cast %579 : vector<1x1x8x128xf32> to vector<8x128xf32>
    %581 = arith.addf %580, %559 : vector<8x128xf32>
    %c0_223 = arith.constant 0 : index
    %c3_224 = arith.constant 3 : index
    %c0_225 = arith.constant 0 : index
    %c0_226 = arith.constant 0 : index
    %582 = vector.load %arg3[%c0_223, %c3_224, %c0_225, %c0_226] : memref<1x6x8x128xf32, #tpu.memory_space<vmem>>, vector<1x1x8x128xf32>
    %583 = vector.shape_cast %582 : vector<1x1x8x128xf32> to vector<8x128xf32>
    %584 = vector.shape_cast %581 : vector<8x128xf32> to vector<1x1x8x128xf32>
    tpu.vector_store %arg3[%c0_223, %c3_224, %c0_225, %c0_226], %584 {strides = array<i32>} : memref<1x6x8x128xf32, #tpu.memory_space<vmem>>, vector<1x1x8x128xf32>,
    %c0_227 = arith.constant 0 : index
    %c4_228 = arith.constant 4 : index
    %c0_229 = arith.constant 0 : index
    %c0_230 = arith.constant 0 : index
    %585 = vector.load %arg3[%c0_227, %c4_228, %c0_229, %c0_230] : memref<1x6x8x128xf32, #tpu.memory_space<vmem>>, vector<1x1x8x128xf32>
    %586 = vector.shape_cast %585 : vector<1x1x8x128xf32> to vector<8x128xf32>
    %587 = arith.addf %586, %560 : vector<8x128xf32>
    %c0_231 = arith.constant 0 : index
    %c4_232 = arith.constant 4 : index
    %c0_233 = arith.constant 0 : index
    %c0_234 = arith.constant 0 : index
    %588 = vector.load %arg3[%c0_231, %c4_232, %c0_233, %c0_234] : memref<1x6x8x128xf32, #tpu.memory_space<vmem>>, vector<1x1x8x128xf32>
    %589 = vector.shape_cast %588 : vector<1x1x8x128xf32> to vector<8x128xf32>
    %590 = vector.shape_cast %587 : vector<8x128xf32> to vector<1x1x8x128xf32>
    tpu.vector_store %arg3[%c0_231, %c4_232, %c0_233, %c0_234], %590 {strides = array<i32>} : memref<1x6x8x128xf32, #tpu.memory_space<vmem>>, vector<1x1x8x128xf32>,
    %c0_235 = arith.constant 0 : index
    %c5_236 = arith.constant 5 : index
    %c0_237 = arith.constant 0 : index
    %c0_238 = arith.constant 0 : index
    %591 = vector.load %arg3[%c0_235, %c5_236, %c0_237, %c0_238] : memref<1x6x8x128xf32, #tpu.memory_space<vmem>>, vector<1x1x8x128xf32>
    %592 = vector.shape_cast %591 : vector<1x1x8x128xf32> to vector<8x128xf32>
    %593 = arith.addf %592, %208 : vector<8x128xf32>
    %c0_239 = arith.constant 0 : index
    %c5_240 = arith.constant 5 : index
    %c0_241 = arith.constant 0 : index
    %c0_242 = arith.constant 0 : index
    %594 = vector.load %arg3[%c0_239, %c5_240, %c0_241, %c0_242] : memref<1x6x8x128xf32, #tpu.memory_space<vmem>>, vector<1x1x8x128xf32>
    %595 = vector.shape_cast %594 : vector<1x1x8x128xf32> to vector<8x128xf32>
    %596 = vector.shape_cast %593 : vector<8x128xf32> to vector<1x1x8x128xf32>
    tpu.vector_store %arg3[%c0_239, %c5_240, %c0_241, %c0_242], %596 {strides = array<i32>} : memref<1x6x8x128xf32, #tpu.memory_space<vmem>>, vector<1x1x8x128xf32>,
    return
  }
  func.func @transform_0(%arg0: i32, %arg1: i32) -> (i32, i32, i32) {
    %c2_i32 = arith.constant 2 : i32
    %0 = arith.muli %arg0, %c2_i32 : i32
    %1 = arith.addi %0, %arg1 : i32
    %c0_i32 = arith.constant 0 : i32
    %c0_i32_0 = arith.constant 0 : i32
    %c0_i32_1 = arith.constant 0 : i32
    return %c0_i32, %1, %c0_i32_0 : i32, i32, i32
  }
  func.func @transform_1(%arg0: i32, %arg1: i32) -> (i32, i32, i32, i32) {
    %c0_i32 = arith.constant 0 : i32
    %c0_i32_0 = arith.constant 0 : i32
    %c0_i32_1 = arith.constant 0 : i32
    %c0_i32_2 = arith.constant 0 : i32
    return %arg0, %c0_i32, %c0_i32_0, %c0_i32_1 : i32, i32, i32, i32
  }
}

</mosaic_0001>

<bundles_post_ra>
// kernel: tpu_custom_call.1
= control target key start
LH: loop header
LB: loop body
LE: loop exit
PB: predicated region body
PF: predicated region fallthrough
CT: control target
= control target key end

     0   :  { %6 = vsyncpa [#allocation3], 0  ;;  %s1302_s0 = inlined_call_operand.hbm [shape: f32[26,16,128], index: 0, kind: input, shape index: {}]   ;;  %s1303_s1 = inlined_call_operand.hbm [shape: f32[1,6,8,128], index: 1, kind: output, shape index: {}]  }
   0x1   :  { %8 = vsyncpa [#allocation3 + $0x1], 0 }
   0x2   :  { %9 = vsyncpa [#allocation4], 0  ;;  %s982_s6 = smov 0   ;;  %s984_s7 = smov 0  }
   0x3   :  { %s986_s8 = smov 0   ;;  %s988_s9 = smov 0  }
   0x4   :  { %s990_s10 = smov 0   ;;  %s992_s11 = smov 0  }
   0x5 LB: > { %s689_s12 = sadd.s32 4294967295, %s962_s11   ;;  %s24_s13 = sadd.s32 1, %s958_s10  ;;  %s962_s11 = sphi %s992_s11, %s15_s11   ;;  %s958_s10 = sphi %s990_s10, %s1309_s10   ;;  %s954_s9 = sphi %s988_s9, %s1308_s9   ;;  %s950_s8 = sphi %s986_s8, %s1307_s8   ;;  %s946_s7 = sphi %s984_s7, %s1306_s7   ;;  %s942_s6 = sphi %s982_s6, %s1305_s6  }
   0x6   : > { %p25_p0 = scmp.ge.s32.totalorder %s24_s13, 2  ;;  %s38_s14 = sadd.s32 1, %s950_s8 }
   0x7   : > { %p45_p1 = scmp.ne.s32.totalorder %s950_s8, %s946_s7  ;;  %p46_p2 = scmp.eq.s32.totalorder %s962_s11, 0 }
   0x8   : > { %s1311_s13 = smov (%p25_p0, %s24_s13), 0  ;;  %p51_p4 = scmp.ne.s32.totalorder %s946_s7, %s942_s6 }
   0x9   : > { %p47_p3 = por %p46_p2, %p45_p1  ;;  %s35_s15 = ssub.s32 %s958_s10, %s1311_s13 }
   0xa   : > { %p52_p5 = scmp.eq.s32.totalorder %s689_s12, 0  ;;  %p36_p6 = scmp.eq.s32.totalorder %s35_s15, 0 }
   0xb   : > { %p743_p8 = scmp.lt.s32.totalorder %s962_s11, 2  ;;  %s101_s18 = sand.u32 1, %s950_s8  }
   0xc   : > { %p1023_p7 = por %p52_p5, %p51_p4  ;;  %s692_s19 = sshll.u32 %s958_s10, 3 }
   0xd   : > { %s1029_s17 = scalar_select %p36_p6, %s950_s8, %s38_s14  }
   0xe   : > { %s731_s20 = smul.u32 208, %s101_s18  ;;  %s111_s23 = scalar_lea.hbm %s1302_s0, %s692_s19 }
   0xf   : > { %p740_p9 = pnand %p743_p8, %p47_p3  ;;  %s112_s24 = sshll.u32 %s111_s23, 4  ;;  %s113_s24 = int_to_ptr.hbm [resolvable:$true] %s112_s24 }
  0x10   : > { %s105_s25 = scalar_lea.vmem [#allocation2], %s731_s20  ;;  %p693_p10 = scmp.ge.s32.totalorder %s962_s11, 1 }
  0x11   : > { %s114_s26 = sshll.u32 %s105_s25, 4  ;;  %s102_s27 = scalar_lea.sflag [#allocation3], %s101_s18  ;;  %s115_s26 = int_to_ptr.vmem [resolvable:$true] %s114_s26 }
  0x12   : > { %s964_s28 = smov 256   ;;  %s965_s29 = smov 128  }
  0x13   : > { %s966_s30 = smov 8   ;;  %p122_p11 = scmp.lt.s32.totalorder %s962_s11, 3 }
  0x14   : > { %742 = dma.hbm_to_vmem [thread:$0]  (!%p740_p9), %s113_s24, 3328, %s115_s26, %s102_s27, %s964_s28, %s965_s29, %s966_s30  }
  0x15   : > { %p123_p12 = pnand %p693_p10, %p122_p11 }
  0x16   : > { %s128_s2 = sand.u32 (!%p123_p12), 1, %s946_s7  }
  0x17   : > { %126 = sbr.rel (%p123_p12) target bundleno = 165 (0xa5), region = 24  ;;  %s129_s4 = scalar_lea.sflag (!%p123_p12), [#allocation3], %s128_s2 }
  0x18   : > { %s732_s3 = smul.u32 (!%p123_p12), 208, %s128_s2 }
  0x1a   : > { %s1039_s5 = scalar_lea.vmem (!%p123_p12), [#allocation2], %s732_s3 }
  0x1c   : > { %933 = dma.done.wait (%p1023_p7), %s129_s4, 3328  }
  0x1d   : > { %935 = vsyncadd (%p1023_p7), %s129_s4, 4294963968  ;;  %p694_p13 = scmp.ne.s32.totalorder %s954_s9, 0 }
  0x1f   : > { %152 = sbr.rel (%p694_p13) target bundleno = 43 (0x2b), region = 32 }
  0x24   : > { %v967_v0 = vmov 0.0  }
  0x25   : > { %153 = vst [vmem:[#allocation5] sm:$0xff] %v967_v0 }
  0x26   : > { %154 = vst [vmem:[#allocation5 + $0x8] sm:$0xff] %v967_v0 }
  0x27   : > { %155 = vst [vmem:[#allocation5 + $0x10] sm:$0xff] %v967_v0 }
  0x28   : > { %156 = vst [vmem:[#allocation5 + $0x18] sm:$0xff] %v967_v0 }
  0x29   : > { %157 = vst [vmem:[#allocation5 + $0x20] sm:$0xff] %v967_v0 }
  0x2a   : > { %158 = vst [vmem:[#allocation5 + $0x28] sm:$0xff] %v967_v0 }
  0x2b PF: > { %s695_s6 = sshll.u32 %s954_s9, 10  ;;  %v162_v1 = vlaneseq  ;;  %v697_v2 = vld [vmem:[%s1039_s5 + $0x88] sm:$0xff]  ;;  %v1049_v3 = vld [vmem:[%s1039_s5] sm:$0xff]  ;;  %v700_v7 = vld [vmem:[%s1039_s5 + $0x50] sm:$0xff]  ;;  %v968_v12 = vmov 0.0   ;;  %s969_s9 = smov [#allocation5]  }
  0x2c   : > { %v699_v4 = vld [vmem:[%s1039_s5 + $0x48] sm:$0xff]  ;;  %vm175_vm0 = vcmp.gt.f32.partialorder %v697_v2, 0.5  ;;  %v182_v5 = vmul.f32 0.5, %v1049_v3  ;;  %v191_v6 = vmax.f32 %v1049_v3, 0.0  ;;  %v701_v8 = vld [vmem:[%s1039_s5 + $0x58] sm:$0xff]  ;;  %v702_v9 = vld [vmem:[%s1039_s5 + $0x60] sm:$0xff]  ;;  %v167_v11 = vstv %s695_s6 }
  0x2d   : > { %v163_v10 = vshrl.u32 %v162_v1, 7  ;;  %v698_v13 = vsel %vm175_vm0, 1.0, %v968_v12  ;;  %v205_v14 = vmul.f32 0.5, %v699_v4  ;;  %v165_v15 = vand.u32 127, %v162_v1  ;;  %v1063_v21 = vld [vmem:[%s1039_s5 + $0x80] sm:$0xff]  ;;  %v711_v22 = vld [vmem:[%s1039_s5 + $0x8] sm:$0xff] }
  0x2e   : > { %802 = vtanh.f32 %v182_v5  ;;  %v1060_v16 = vsub.f32 %v191_v6, %v1049_v3  ;;  %v211_v17 = vmul.f32 0.5, %v700_v7  ;;  %v217_v19 = vmul.f32 0.5, %v701_v8  ;;  %v1067_v23 = vld [vmem:[%s1039_s5 + $0x90] sm:$0xff]  ;;  %v1073_v31 = vld [vmem:[%s1039_s5 + $0x98] sm:$0xff]  ;;  %v1105_v1 = vld [vmem:[%s1039_s5 + $0x68] sm:$0xff]  ;;  %s620_s14 = sshll.u32 %s969_s9, 4  ;;  %s621_s14 = int_to_ptr.vmem [resolvable:$true] %s620_s14 }
  0x2f   : > { %v166_v18 = vmul.u32 128, %v163_v10  ;;  %804 = vtanh.f32 %v205_v14  ;;  %v223_v20 = vmul.f32 0.5, %v702_v9  ;;  %v179_v24 = vsub.f32 1.0, %v698_v13  ;;  %v713_v27 = vld [vmem:[%s1039_s5 + $0x10] sm:$0xff]  ;;  %v1080_v35 = vld [vmem:[%s1039_s5 + $0x18] sm:$0xff]  ;;  %s622_s18 = sshll.u32 %s1303_s1, 4  ;;  %s623_s18 = int_to_ptr.hbm [resolvable:$true] %s622_s18 }
  0x30   : > { %806 = vtanh.f32 %v211_v17  ;;  %v345_v25 = vmul.f32 0.5, %v711_v22  ;;  %v349_v26 = vmax.f32 %v711_v22, 0.0  ;;  %v350_v29 = vmul.f32 %v1067_v23, %v711_v22  ;;  %v1114_v8 = vld [vmem:[%s1039_s5 + $0x70] sm:$0xff]  ;;  %v1131_v22 = vld [vmem:[%s1039_s5 + $0xa0] sm:$0xff]  ;;  %p744_p0 = scmp.eq.s32.totalorder %s689_s12, 1  ;;  %s970_s19 = smov 128  }
  0x31   : > { %v168_v28 = vadd.s32 %v167_v11, %v166_v18  ;;  %808 = vtanh.f32 %v217_v19  ;;  %v359_v30 = vsub.f32 1.0, %v1067_v23  ;;  %v1076_v32 = vmul.f32 0.5, %v1063_v21  ;;  %s971_s20 = smov 8  }
  0x32   : > { %810 = vtanh.f32 %v223_v20  ;;  %v362_v33 = vmul.f32 0.25, %v1067_v23  ;;  %v374_v34 = vmul.f32 0.5, %v713_v27  ;;  %v378_v38 = vmax.f32 %v713_v27, 0.0 }
  0x33   : > { %v169_v36 = vadd.s32 %v168_v28, %v165_v15  ;;  %812 = vtanh.f32 %v345_v25  ;;  %v363_v37 = vmul.f32 0.75, %v359_v30  ;;  %v1084_v40 = vsub.f32 %v349_v26, %v350_v29 }
  0x34   : > { %v803_v39 = vpop.eup %802  ;;  %814 = vtanh.f32 %v374_v34  ;;  %v379_v41 = vmul.f32 %v1073_v31, %v713_v27  ;;  %v388_v42 = vsub.f32 1.0, %v1073_v31  ;;  %v391_v45 = vmul.f32 0.25, %v1073_v31 }
  0x35   : > { %v805_v43 = vpop.eup %804  ;;  %vm170_vm1 = vcmp.lt.s32.totalorder %v169_v36, 1920  ;;  %v184_v44 = vadd.f32 1.0, %v803_v39  ;;  %v405_v46 = vmul.f32 0.5, %v1080_v35  ;;  %v1090_v50 = vadd.f32 %v363_v37, %v362_v33 }
  0x36   : > { %v807_v47 = vpop.eup %806  ;;  %v696_v48 = vsel %vm170_vm1, 1.0, %v968_v12  ;;  %v207_v49 = vadd.f32 1.0, %v805_v43  ;;  %v392_v51 = vmul.f32 0.75, %v388_v42  ;;  %v1096_v56 = vsub.f32 %v378_v38, %v379_v41 }
  0x37   : > { %v809_v52 = vpop.eup %808  ;;  %v1094_v53 = vmul.f32 %v698_v13, %v696_v48  ;;  %v185_v54 = vmul.f32 0.5, %v184_v44  ;;  %v213_v55 = vadd.f32 1.0, %v807_v47  ;;  %v1098_v58 = vmul.f32 %v696_v48, %v179_v24  ;;  %v1121_v13 = vld [vmem:[%s1039_s5 + $0x78] sm:$0xff] }
  0x38   : > { %v811_v57 = vpop.eup %810  ;;  %v1100_v59 = vmul.f32 0.5, %v207_v49  ;;  %v219_v60 = vadd.f32 1.0, %v809_v52  ;;  %816 = vtanh.f32 %v405_v46  ;;  %v1107_v2 = vadd.f32 %v392_v51, %v391_v45 }
  0x39   : > { %v813_v61 = vpop.eup %812  ;;  %v186_v62 = vsub.f32 1.0, %v185_v54  ;;  %v1102_v63 = vmul.f32 0.5, %v213_v55  ;;  %v225_v0 = vadd.f32 1.0, %v811_v57  ;;  %v1109_v5 = vmul.f32 %v185_v54, %v185_v54 }
  0x3a   : > { %v815_v4 = vpop.eup %814  ;;  %v1111_v7 = vmul.f32 0.5, %v219_v60  ;;  %v235_v9 = vsub.f32 %v1100_v59, %v1105_v1  ;;  %v347_v10 = vadd.f32 1.0, %v813_v61  ;;  %v409_v15 = vmax.f32 %v1080_v35, 0.0 }
  0x3b   : > { %v187_v11 = vmax.f32 %v185_v54, %v186_v62  ;;  %v1118_v12 = vmul.f32 0.5, %v225_v0  ;;  %v242_v14 = vsub.f32 %v1102_v63, %v1114_v8  ;;  %v376_v20 = vadd.f32 1.0, %v815_v4 }
  0x3c   : > { %v236_v17 = vand.u32 2147483647, %v235_v9  ;;  %v250_v18 = vsub.f32 %v1111_v7, %v1121_v13  ;;  %v1128_v19 = vmul.f32 0.5, %v347_v10  ;;  %v410_v26 = vmul.f32 %v1131_v22, %v1080_v35 }
  0x3d   : > { %818 = vlog2.f32 %v187_v11  ;;  %v243_v24 = vand.u32 2147483647, %v242_v14  ;;  %v258_v25 = vsub.f32 %v1118_v12, %v1063_v21  ;;  %v1143_v44 = vmul.f32 0.5, %v376_v20 }
  0x3e   : > { %v817_v27 = vpop.eup %816  ;;  %vm237_vm2 = vcmp.lt.f32.partialorder %v236_v17, 2e-05  ;;  %v238_v28 = vmul.f32 25000.0, %v236_v17  ;;  %v707_v29 = vadd.f32 -1e-05, %v236_v17  ;;  %v352_v33 = vsub.f32 1.0, %v1128_v19 }
  0x3f   : > { %vm244_vm3 = vcmp.lt.f32.partialorder %v243_v24, 2e-05  ;;  %v245_v34 = vmul.f32 25000.0, %v243_v24  ;;  %v708_v36 = vadd.f32 -1e-05, %v243_v24  ;;  %v358_v37 = vmul.f32 %v1067_v23, %v1128_v19 }
  0x40   : > { %v239_v38 = vmul.f32 %v238_v28, %v236_v17  ;;  %v251_v39 = vand.u32 2147483647, %v250_v18  ;;  %v259_v41 = vand.u32 2147483647, %v258_v25  ;;  %v353_v21 = vmax.f32 %v1128_v19, %v352_v33 }
  0x41   : > { %v246_v43 = vmul.f32 %v245_v34, %v243_v24  ;;  %v360_v35 = vmul.f32 %v359_v30, %v352_v33  ;;  %v407_v45 = vadd.f32 1.0, %v817_v27  ;;  %v196_v23 = vmul.f32 %v186_v62, %v186_v62 }
  0x42   : > { %v241_v46 = vsel %vm237_vm2, %v239_v38, %v707_v29  ;;  %vm252_vm4 = vcmp.lt.f32.partialorder %v251_v39, 2e-05  ;;  %v253_v47 = vmul.f32 25000.0, %v251_v39  ;;  %v709_v48 = vadd.f32 -1e-05, %v251_v39  ;;  %v717_v38 = vld [vmem:[%s1039_s5 + $0x20] sm:$0xff] }
  0x43   : > { %v819_v49 = vpop.eup %818  ;;  %v248_v51 = vsel %vm244_vm3, %v246_v43, %v708_v36  ;;  %vm260_vm5 = vcmp.lt.f32.partialorder %v259_v41, 2e-05  ;;  %v261_v52 = vmul.f32 25000.0, %v259_v41  ;;  %v710_v54 = vadd.f32 -1e-05, %v259_v41  ;;  %v597_v36 = vld [vmem:[#allocation5 + $0x10] sm:$0xff] }
  0x44   : > { %v189_v55 = vmul.f32 0.6931472, %v819_v49  ;;  %v249_v57 = vadd.f32 %v248_v51, %v241_v46  ;;  %v254_v60 = vmul.f32 %v253_v47, %v251_v39  ;;  %820 = vlog2.f32 %v353_v21  ;;  %v589_v43 = vld [vmem:[#allocation5] sm:$0xff] }
  0x45   : > { %v262_v30 = vmul.f32 %v261_v52, %v259_v41  ;;  %v361_v61 = vadd.f32 %v360_v35, %v358_v37  ;;  %v381_v0 = vsub.f32 1.0, %v1143_v44  ;;  %v387_v10 = vmul.f32 %v1073_v31, %v1143_v44  ;;  %v593_v35 = vld [vmem:[#allocation5 + $0x8] sm:$0xff] }
  0x46   : > { %v190_v4 = vsub.f32 0.0, %v189_v55  ;;  %v256_v9 = vsel %vm252_vm4, %v254_v60, %v709_v48  ;;  %v1151_v11 = vmul.f32 0.5, %v407_v45  ;;  %v1155_v20 = vsub.f32 %v409_v15, %v410_v26 }
  0x47   : > { %v257_v14 = vadd.f32 %v256_v9, %v249_v57  ;;  %v264_v17 = vsel %vm260_vm5, %v262_v30, %v710_v54  ;;  %v382_v18 = vmax.f32 %v1143_v44, %v381_v0  ;;  %v389_v25 = vmul.f32 %v388_v42, %v381_v0  ;;  %v719_v30 = vld [vmem:[%s1039_s5 + $0x28] sm:$0xff] }
  0x48   : > { %v193_v62 = vadd.f32 %v1060_v16, %v190_v4  ;;  %v194_v24 = vadd.f32 %v191_v6, %v190_v4  ;;  %v412_v27 = vsub.f32 1.0, %v1151_v11  ;;  %v366_v29 = vsub.f32 1.0, %v361_v61 }
  0x49   : > { %v265_v28 = vadd.f32 %v264_v17, %v257_v14  ;;  %822 = vlog2.f32 %v382_v18  ;;  %v418_v33 = vmul.f32 %v1131_v22, %v1151_v11  ;;  %v390_v16 = vadd.f32 %v389_v25, %v387_v10  ;;  %v721_v18 = vld [vmem:[%s1039_s5 + $0x30] sm:$0xff] }
  0x4a   : > { %v821_v34 = vpop.eup %820  ;;  %v195_v15 = vmul.f32 0.25, %v193_v62  ;;  %v199_v26 = vmul.f32 0.75, %v194_v24  ;;  %v413_v3 = vmax.f32 %v1151_v11, %v412_v27  ;;  %v419_v42 = vsub.f32 1.0, %v1131_v22 }
  0x4b   : > { %v266_v6 = vmul.f32 %v265_v28, %v1094_v53  ;;  %v355_v31 = vmul.f32 0.6931472, %v821_v34  ;;  %v422_v37 = vmul.f32 0.25, %v1131_v22  ;;  %v395_v21 = vsub.f32 1.0, %v390_v16 }
  0x4c   : > { %v197_v39 = vmul.f32 %v196_v23, %v195_v15  ;;  %v201_v41 = vmul.f32 %v1109_v5, %v199_v26  ;;  %824 = vlog2.f32 %v413_v3  ;;  %v420_v47 = vmul.f32 %v419_v42, %v412_v27  ;;  %v1175_v23 = vld [vmem:[%s1039_s5 + $0xa8] sm:$0xff]  ;;  %v1184_v27 = vld [vmem:[%s1039_s5 + $0xb0] sm:$0xff] }
  0x4d   : > { %v598_v45 = vadd.f32 %v597_v36, %v266_v6  ;;  %v356_v46 = vsub.f32 0.0, %v355_v31  ;;  %v423_v48 = vmul.f32 0.75, %v419_v42  ;;  %v367_v52 = vmul.f32 %v366_v29, %v366_v29  ;;  %v1192_v31 = vld [vmem:[%s1039_s5 + $0xb8] sm:$0xff] }
  0x4e   : > { %v198_v49 = vmul.f32 %v197_v39, %v1094_v53  ;;  %v202_v51 = vmul.f32 %v201_v41, %v1098_v58  ;;  %v436_v22 = vmul.f32 0.5, %v717_v38  ;;  %v396_v55 = vmul.f32 %v395_v21, %v395_v21  ;;  %v723_v21 = vld [vmem:[%s1039_s5 + $0x38] sm:$0xff] }
  0x4f   : > { %v823_v54 = vpop.eup %822  ;;  %599 = vst [vmem:[#allocation5 + $0x10] sm:$0xff] %v598_v45  ;;  %v357_v5 = vadd.f32 %v356_v46, %v1084_v40  ;;  %v421_v57 = vadd.f32 %v420_v47, %v418_v33  ;;  %v424_v60 = vadd.f32 %v423_v48, %v422_v37  ;;  %v440_v14 = vmax.f32 %v717_v38, 0.0 }
  0x50   : > { %v590_v61 = vadd.f32 %v589_v43, %v198_v49  ;;  %v594_v0 = vadd.f32 %v593_v35, %v202_v51  ;;  %v384_v4 = vmul.f32 0.6931472, %v823_v54  ;;  %826 = vtanh.f32 %v436_v22  ;;  %v1208_v22 = vld [vmem:[%s1039_s5 + $0xc0] sm:$0xff] }
  0x51   : > { %v365_v9 = vmul.f32 %v1090_v50, %v357_v5  ;;  %v426_v10 = vsub.f32 1.0, %v421_v57  ;;  %v441_v17 = vmul.f32 %v1175_v23, %v717_v38  ;;  %v450_v24 = vsub.f32 1.0, %v1175_v23 }
  0x52   : > { %v825_v62 = vpop.eup %824  ;;  %591 = vst [vmem:[#allocation5] sm:$0xff] %v590_v61  ;;  %v385_v40 = vsub.f32 0.0, %v384_v4  ;;  %v453_v25 = vmul.f32 0.25, %v1175_v23  ;;  %v467_v28 = vmul.f32 0.5, %v719_v30  ;;  %v471_v34 = vmax.f32 %v719_v30, 0.0 }
  0x53   : > { %595 = vst [vmem:[#allocation5 + $0x8] sm:$0xff] %v594_v0  ;;  %v368_v29 = vmul.f32 %v367_v52, %v365_v9  ;;  %v415_v33 = vmul.f32 0.6931472, %v825_v62  ;;  %v427_v50 = vmul.f32 %v426_v10, %v426_v10  ;;  %v454_v26 = vmul.f32 0.75, %v450_v24 }
  0x54   : > { %v386_v15 = vadd.f32 %v385_v40, %v1096_v56  ;;  %828 = vtanh.f32 %v467_v28  ;;  %v472_v36 = vmul.f32 %v1184_v27, %v719_v30  ;;  %v1188_v3 = vsub.f32 %v440_v14, %v441_v17  ;;  %v725_v28 = vld [vmem:[%s1039_s5 + $0x40] sm:$0xff] }
  0x55   : > { %v416_v16 = vsub.f32 0.0, %v415_v33  ;;  %v481_v6 = vsub.f32 1.0, %v1184_v27  ;;  %v498_v42 = vmul.f32 0.5, %v721_v18  ;;  %v1195_v39 = vadd.f32 %v454_v26, %v453_v25 }
  0x56   : > { %v827_v37 = vpop.eup %826  ;;  %v394_v38 = vmul.f32 %v1107_v2, %v386_v15  ;;  %v484_v56 = vmul.f32 0.25, %v1184_v27  ;;  %v502_v41 = vmax.f32 %v721_v18, 0.0  ;;  %v1200_v47 = vsub.f32 %v471_v34, %v472_v36 }
  0x57   : > { %v417_v43 = vadd.f32 %v416_v16, %v1155_v20  ;;  %v438_v35 = vadd.f32 1.0, %v827_v37  ;;  %v485_v45 = vmul.f32 0.75, %v481_v6  ;;  %830 = vtanh.f32 %v498_v42 }
  0x58   : > { %v397_v46 = vmul.f32 %v396_v55, %v394_v38  ;;  %v503_v48 = vmul.f32 %v1192_v31, %v721_v18  ;;  %v512_v49 = vsub.f32 1.0, %v1192_v31  ;;  %v515_v52 = vmul.f32 0.25, %v1192_v31 }
  0x59   : > { %v425_v2 = vmul.f32 %v424_v60, %v417_v43  ;;  %v1204_v51 = vmul.f32 0.5, %v438_v35  ;;  %v529_v54 = vmul.f32 0.5, %v723_v21  ;;  %v1210_v57 = vadd.f32 %v485_v45, %v484_v56 }
  0x5a   : > { %v829_v5 = vpop.eup %828  ;;  %v399_v20 = vadd.f32 %v397_v46, %v368_v29  ;;  %v1212_v55 = vsub.f32 %v502_v41, %v503_v48  ;;  %v516_v30 = vmul.f32 0.75, %v512_v49  ;;  %v533_v9 = vmax.f32 %v723_v21, 0.0 }
  0x5b   : > { %v428_v61 = vmul.f32 %v427_v50, %v425_v2  ;;  %v443_v0 = vsub.f32 1.0, %v1204_v51  ;;  %v449_v60 = vmul.f32 %v1175_v23, %v1204_v51  ;;  %v469_v4 = vadd.f32 1.0, %v829_v5 }
  0x5c   : > { %832 = vtanh.f32 %v529_v54  ;;  %v534_v10 = vmul.f32 %v1208_v22, %v723_v21  ;;  %v543_v14 = vsub.f32 1.0, %v1208_v22  ;;  %v1220_v25 = vadd.f32 %v516_v30, %v515_v52 }
  0x5d   : > { %v831_v17 = vpop.eup %830  ;;  %v444_v18 = vmax.f32 %v1204_v51, %v443_v0  ;;  %v451_v62 = vmul.f32 %v450_v24, %v443_v0  ;;  %v470_v40 = vmul.f32 0.5, %v469_v4  ;;  %v1223_v29 = vadd.f32 %v428_v61, %v399_v20  ;;  %v1232_v24 = vld [vmem:[%s1039_s5 + $0xc8] sm:$0xff] }
  0x5e   : > { %v500_v33 = vadd.f32 1.0, %v831_v17  ;;  %v546_v23 = vmul.f32 0.25, %v1208_v22  ;;  %v547_v50 = vmul.f32 0.75, %v543_v14  ;;  %v1227_v16 = vsub.f32 %v533_v9, %v534_v10 }
  0x5f   : > { %834 = vlog2.f32 %v444_v18  ;;  %v452_v34 = vadd.f32 %v451_v62, %v449_v60  ;;  %v474_v15 = vsub.f32 1.0, %v470_v40  ;;  %v480_v26 = vmul.f32 %v1184_v27, %v470_v40 }
  0x60   : > { %v501_v36 = vmul.f32 0.5, %v500_v33  ;;  %v1229_v42 = vadd.f32 %v547_v50, %v546_v23  ;;  %v560_v37 = vmul.f32 0.5, %v725_v28  ;;  %v564_v21 = vmax.f32 %v725_v28, 0.0 }
  0x61   : > { %v457_v38 = vsub.f32 1.0, %v452_v34  ;;  %v475_v56 = vmax.f32 %v470_v40, %v474_v15  ;;  %v482_v41 = vmul.f32 %v481_v6, %v474_v15  ;;  %v565_v46 = vmul.f32 %v1232_v24, %v725_v28 }
  0x62   : > { %v833_v43 = vpop.eup %832  ;;  %v505_v35 = vsub.f32 1.0, %v501_v36  ;;  %v511_v45 = vmul.f32 %v1192_v31, %v501_v36  ;;  %836 = vtanh.f32 %v560_v37  ;;  %v574_v2 = vsub.f32 1.0, %v1232_v24 }
  0x63   : > { %838 = vlog2.f32 %v475_v56  ;;  %v483_v27 = vadd.f32 %v482_v41, %v480_v26  ;;  %v531_v48 = vadd.f32 1.0, %v833_v43  ;;  %v458_v52 = vmul.f32 %v457_v38, %v457_v38 }
  0x64   : > { %v506_v54 = vmax.f32 %v501_v36, %v505_v35  ;;  %v513_v5 = vmul.f32 %v512_v49, %v505_v35  ;;  %v577_v20 = vmul.f32 0.25, %v1232_v24  ;;  %v578_v0 = vmul.f32 0.75, %v574_v2 }
  0x65   : > { %v835_v30 = vpop.eup %834  ;;  %v488_v6 = vsub.f32 1.0, %v483_v27  ;;  %v532_v61 = vmul.f32 0.5, %v531_v48  ;;  %v369_v31 = vmul.f32 %v1128_v19, %v1128_v19  ;;  %v398_v9 = vmul.f32 %v1143_v44, %v1143_v44 }
  0x66   : > { %v446_v60 = vmul.f32 0.6931472, %v835_v30  ;;  %840 = vlog2.f32 %v506_v54  ;;  %v514_v4 = vadd.f32 %v513_v5, %v511_v45  ;;  %v1243_v49 = vsub.f32 %v564_v21, %v565_v46 }
  0x67   : > { %v489_v10 = vmul.f32 %v488_v6, %v488_v6  ;;  %v536_v17 = vsub.f32 1.0, %v532_v61  ;;  %v542_v18 = vmul.f32 %v1208_v22, %v532_v61  ;;  %v400_v23 = vadd.f32 %v398_v9, %v369_v31 }
  0x68   : > { %v837_v62 = vpop.eup %836  ;;  %v447_v28 = vsub.f32 0.0, %v446_v60  ;;  %v519_v33 = vsub.f32 1.0, %v514_v4  ;;  %v429_v50 = vmul.f32 %v1151_v11, %v1151_v11  ;;  %v460_v44 = vmul.f32 %v1204_v51, %v1204_v51 }
  0x69   : > { %v839_v19 = vpop.eup %838  ;;  %v537_v34 = vmax.f32 %v532_v61, %v536_v17  ;;  %v544_v15 = vmul.f32 %v543_v14, %v536_v17  ;;  %v562_v26 = vadd.f32 1.0, %v837_v62  ;;  %v1250_v22 = vadd.f32 %v578_v0, %v577_v20 }
  0x6a   : > { %v448_v37 = vadd.f32 %v447_v28, %v1188_v3  ;;  %v477_v38 = vmul.f32 0.6931472, %v839_v19  ;;  %v431_v56 = vadd.f32 %v429_v50, %v400_v23  ;;  %v491_v43 = vmul.f32 %v470_v40, %v470_v40 }
  0x6b   : > { %842 = vlog2.f32 %v537_v34  ;;  %v545_v41 = vadd.f32 %v544_v15, %v542_v18  ;;  %v563_v21 = vmul.f32 0.5, %v562_v26  ;;  %v522_v14 = vmul.f32 %v501_v36, %v501_v36 }
  0x6c   : > { %v841_v35 = vpop.eup %840  ;;  %v456_v11 = vmul.f32 %v1195_v39, %v448_v37  ;;  %v478_v45 = vsub.f32 0.0, %v477_v38  ;;  %v462_v46 = vadd.f32 %v460_v44, %v431_v56  ;;  %v520_v48 = vmul.f32 %v519_v33, %v519_v33 }
  0x6d   : > { %v508_v27 = vmul.f32 0.6931472, %v841_v35  ;;  %v567_v54 = vsub.f32 1.0, %v563_v21  ;;  %v573_v51 = vmul.f32 %v1232_v24, %v563_v21  ;;  %v553_v30 = vmul.f32 %v532_v61, %v532_v61 }
  0x6e   : > { %v459_v3 = vmul.f32 %v458_v52, %v456_v11  ;;  %v479_v5 = vadd.f32 %v478_v45, %v1200_v47  ;;  %v493_v20 = vadd.f32 %v491_v43, %v462_v46  ;;  %v550_v0 = vsub.f32 1.0, %v545_v41 }
  0x6f   : > { %v509_v6 = vsub.f32 0.0, %v508_v27  ;;  %v568_v31 = vmax.f32 %v563_v21, %v567_v54  ;;  %v575_v40 = vmul.f32 %v574_v2, %v567_v54  ;;  %v584_v36 = vmul.f32 %v563_v21, %v563_v21 }
  0x70   : > { %v461_v60 = vadd.f32 %v459_v3, %v1223_v29  ;;  %v487_v39 = vmul.f32 %v1210_v57, %v479_v5  ;;  %v524_v4 = vadd.f32 %v522_v14, %v493_v20  ;;  %v267_v52 = vmul.f32 0.5, %v1111_v7  ;;  %v605_v7 = vld [vmem:[#allocation5 + $0x20] sm:$0xff] }
  0x71   : > { %v843_v9 = vpop.eup %842  ;;  %v510_v17 = vadd.f32 %v509_v6, %v1212_v55  ;;  %844 = vlog2.f32 %v568_v31  ;;  %v576_v24 = vadd.f32 %v575_v40, %v573_v51  ;;  %v269_v62 = vmul.f32 0.5, %v1118_v12 }
  0x72   : > { %v490_v47 = vmul.f32 %v489_v10, %v487_v39  ;;  %v539_v18 = vmul.f32 0.6931472, %v843_v9  ;;  %v555_v61 = vadd.f32 %v553_v30, %v524_v4  ;;  %v551_v28 = vmul.f32 %v550_v0, %v550_v0 }
  0x73   : > { %v518_v2 = vmul.f32 %v1220_v25, %v510_v17  ;;  %v268_v29 = vsub.f32 %v1100_v59, %v267_v52  ;;  %v271_v57 = vadd.f32 %v267_v52, %v1100_v59  ;;  %v270_v55 = vsub.f32 %v1102_v63, %v269_v62 }
  0x74   : > { %v492_v33 = vadd.f32 %v490_v47, %v461_v60  ;;  %v540_v23 = vsub.f32 0.0, %v539_v18  ;;  %v586_v50 = vadd.f32 %v584_v36, %v555_v61  ;;  %v581_v34 = vsub.f32 1.0, %v576_v24  ;;  %v601_v24 = vld [vmem:[#allocation5 + $0x18] sm:$0xff] }
  0x75   : > { %v521_v19 = vmul.f32 %v520_v48, %v518_v2  ;;  %v272_v10 = vadd.f32 %v269_v62, %v1102_v63  ;;  %v273_v15 = vmul.f32 0.5, %v1121_v13  ;;  %v276_v26 = vsub.f32 %v1114_v8, %v1076_v32 }
  0x76   : > { %v541_v12 = vadd.f32 %v540_v23, %v1227_v16  ;;  %v588_v25 = vmul.f32 %v586_v50, %v1098_v58  ;;  %v278_v59 = vadd.f32 %v1114_v8, %v1076_v32  ;;  %v290_v41 = vsub.f32 %v271_v57, %v268_v29 }
  0x77   : > { %v845_v44 = vpop.eup %844  ;;  %v523_v37 = vadd.f32 %v521_v19, %v492_v33  ;;  %v274_v38 = vsub.f32 %v1105_v1, %v273_v15  ;;  %v277_v56 = vadd.f32 %v1105_v1, %v273_v15  ;;  %v280_v16 = vmax.f32 %v270_v55, %v276_v26 }
  0x78   : > { %v549_v63 = vmul.f32 %v1229_v42, %v541_v12  ;;  %v570_v13 = vmul.f32 0.6931472, %v845_v44  ;;  %v606_v21 = vadd.f32 %v605_v7, %v588_v25  ;;  %v282_v35 = vmin.f32 %v272_v10, %v278_v59 }
  0x79   : > { %v279_v43 = vmax.f32 %v268_v29, %v274_v38  ;;  %v281_v58 = vmin.f32 %v271_v57, %v277_v56  ;;  %v291_v11 = vsub.f32 %v272_v10, %v270_v55  ;;  %v293_v32 = vsub.f32 %v277_v56, %v274_v38 }
  0x7a   : > { %v552_v45 = vmul.f32 %v551_v28, %v549_v63  ;;  %v571_v46 = vsub.f32 0.0, %v570_v13  ;;  %607 = vst [vmem:[#allocation5 + $0x20] sm:$0xff] %v606_v21  ;;  %v294_v8 = vsub.f32 %v278_v59, %v276_v26  ;;  %vm283_vm6 = vcmp.gt.f32.partialorder %v282_v35, %v280_v16  ;;  %v609_v63 = vld [vmem:[#allocation5 + $0x28] sm:$0xff] }
  0x7b   : > { %vm284_vm7 = vcmp.gt.f32.partialorder %v281_v58, %v279_v43  ;;  %v286_v14 = vsub.f32 %v281_v58, %v279_v43  ;;  %v287_v27 = vsub.f32 %v282_v35, %v280_v16  ;;  %v582_v48 = vmul.f32 %v581_v34, %v581_v34 }
  0x7c   : > { %v572_v1 = vadd.f32 %v571_v46, %v1243_v49  ;;  %vm285_vm8 = vmand %vm283_vm6, %vm284_vm7  ;;  %v292_v42 = vmul.f32 %v291_v11, %v290_v41  ;;  %v295_v54 = vmul.f32 %v294_v8, %v293_v32  ;;  %v298_v3 = vmax.f32 %v271_v57, %v277_v56 }
  0x7d   : > { %v288_v51 = vmul.f32 %v287_v27, %v286_v14  ;;  %v299_v5 = vmin.f32 %v268_v29, %v274_v38  ;;  %v301_v20 = vmax.f32 %v272_v10, %v278_v59  ;;  %v554_v30 = vadd.f32 %v552_v45, %v523_v37 }
  0x7e   : > { %v580_v6 = vmul.f32 %v1250_v22, %v572_v1  ;;  %v296_v0 = vadd.f32 %v295_v54, %v292_v42  ;;  %v302_v31 = vmin.f32 %v270_v55, %v276_v26 }
  0x7f   : > { %v289_v40 = vsel %vm285_vm8, %v288_v51, 0.0  ;;  %v300_v60 = vsub.f32 %v298_v3, %v299_v5 }
  0x80   : > { %v583_v39 = vmul.f32 %v582_v48, %v580_v6  ;;  %v297_v4 = vsub.f32 %v296_v0, %v289_v40  ;;  %v303_v36 = vsub.f32 %v301_v20, %v302_v31 }
  0x82   : > { %v585_v9 = vadd.f32 %v583_v39, %v554_v30  ;;  %v304_v49 = vmul.f32 %v303_v36, %v300_v60  ;;  %v305_v17 = vadd.f32 1e-07, %v297_v4 }
  0x84   : > { %v587_v52 = vmul.f32 %v585_v9, %v1094_v53  ;;  %846 = vrcp.f32 %v305_v17  ;;  %v322_v47 = vadd.f32 1e-07, %v304_v49  ;;  %v317_v62 = vand.u32 2147483648, %v305_v17 }
  0x85   : > { %vm311_vm9 = vweird.f32 %v305_v17  ;;  %v315_v29 = vand.u32 2147483647, %v305_v17  ;;  %v321_v25 = vsub.f32 %v304_v49, %v297_v4 }
  0x86   : > { %v602_v18 = vadd.f32 %v601_v24, %v587_v52  ;;  %848 = vrcp.f32 %v322_v47  ;;  %v318_v23 = vor.u32 1.1754944e-38, %v317_v62  ;;  %v334_v50 = vand.u32 2147483648, %v322_v47 }
  0x87   : > { %vm328_vm12 = vweird.f32 %v322_v47  ;;  %v332_v19 = vand.u32 2147483647, %v322_v47  ;;  %vm316_vm14 = vcmp.eq.f32.partialorder %v315_v29, 8.507059e+37 }
  0x88   : > { %603 = vst [vmem:[#allocation5 + $0x18] sm:$0xff] %v602_v18  ;;  %v335_v15 = vor.u32 1.1754944e-38, %v334_v50 }
  0x89   : > { %vm333_vm0 = vcmp.eq.f32.partialorder %v332_v19, 8.507059e+37 }
  0x8a   : > { %v847_v61 = vpop.eup %846 }
  0x8b   : > { %v307_v22 = vmul.f32 %v847_v61, %v305_v17  ;;  %vm312_vm10 = vweird.f32 %v847_v61 }
  0x8c   : > { %v849_v2 = vpop.eup %848  ;;  %vm313_vm11 = vmor %vm311_vm9, %vm312_vm10 }
  0x8d   : > { %v308_v28 = vsub.f32 1.0, %v307_v22  ;;  %v324_v57 = vmul.f32 %v849_v2, %v322_v47  ;;  %vm329_vm13 = vweird.f32 %v849_v2 }
  0x8e   : > { %vm330_vm15 = vmor %vm328_vm12, %vm329_vm13 }
  0x8f   : > { %v309_v33 = vmul.f32 %v847_v61, %v308_v28  ;;  %v325_v55 = vsub.f32 1.0, %v324_v57 }
  0x91   : > { %v310_v34 = vadd.f32 %v847_v61, %v309_v33  ;;  %v326_v7 = vmul.f32 %v849_v2, %v325_v55 }
  0x93   : > { %v314_v10 = vsel %vm313_vm11, %v847_v61, %v310_v34  ;;  %v327_v26 = vadd.f32 %v849_v2, %v326_v7 }
  0x94   : > { %v319_v12 = vsel %vm316_vm14, %v318_v23, %v314_v10 }
  0x95   : > { %v320_v59 = vmul.f32 %v319_v12, %v289_v40  ;;  %v331_v44 = vsel %vm330_vm15, %v849_v2, %v327_v26 }
  0x96   : > { %v336_v37 = vsel %vm333_vm0, %v335_v15, %v331_v44 }
  0x97   : > { %v337_v38 = vmul.f32 %v336_v37, %v321_v25 }
  0x99   : > { %v338_v56 = vsub.f32 %v320_v59, %v337_v38 }
  0x9b   : > { %v339_v41 = vsub.f32 1.0, %v338_v56 }
  0x9d   : > { %v340_v13 = vmul.f32 %v339_v41, %v1094_v53 }
  0x9f   : > { %v610_v21 = vadd.f32 %v609_v63, %v340_v13 }
  0xa1   : > { %611 = vst [vmem:[#allocation5 + $0x28] sm:$0xff] %v610_v21 }
  0xa2   : > { %736 = dma.vmem_to_hbm [thread:$0]  (%p744_p0), %s621_s14, 768, %s623_s18, [#allocation4], %s970_s19, %s970_s19, %s971_s20  }
  0xa3   : > { %937 = dma.done.wait (%p744_p0), [#allocation4], 768  }
  0xa4   : > { %939 = vsyncadd (%p744_p0), [#allocation4], 4294966528 }
  0xa5 PF: > { %s15_s11 = sadd.s32 1, %s962_s11   ;;  %s1305_s6 = smov %s946_s7 }
  0xa6   : > { %p12_p1 = scmp.ge.s32.totalorder %s15_s11, 4   ;;  %s1306_s7 = smov %s950_s8 }
  0xa7   : > { %s1307_s8 = smov %s1029_s17  ;;  %s1308_s9 = smov %s958_s10 }
  0xa8   : > { %s1309_s10 = smov %s1311_s13  ;;  %14 = sbr.rel (!%p12_p1) target bundleno = 5 (0x5), region = 96 }
  0xad   :  { %639 = vsyncpa [#allocation3], 1 }
  0xae   :  { %641 = vsyncpa [#allocation3 + $0x1], 1 }
  0xaf   :  { %642 = vsyncpa [#allocation4], 1 }
  0xb0   :  { %644 = vsyncpa [#allocation4 + $0x1], 1 }

</bundles_post_ra>
